<compile_context>
chip_gen: v6e
topology: v6e:2x2x1
jax: 0.10.0
libtpu: 0.0.40
codegen_flags: <defaults>
</compile_context>

<pallas_src>
import functools

import numpy as np
import jax
import jax.numpy as jnp
from jax.experimental import pallas as pl
from jax.experimental.pallas import tpu as pltpu

LN_EPS = 1e-5
BN_EPS = 1e-5
PREC = jax.lax.Precision.HIGHEST  # plain-JAX reference only

_STACKED = ("ca_ln_g", "ca_ln_b", "ca_w1", "ca_b1", "ca_bn_sc", "ca_bn_sh",
            "ca_wh", "ca_bh", "ca_ww", "ca_bw",
            "ff_ln_g", "ff_ln_b", "ff_w1", "ff_b1", "ff_w2", "ff_b2")
_CONSTS = ("avg_w", "eh_t", "avg_h", "ew_t")


# ----------------------------------------------------------------------------- tiling
def _pick_batch_block(B, C, HW, *, target_rows=256, tile_budget=4 << 20, min_steps=2):
    """Pick nb (divisor of B): rows 8-aligned, x tile within budget, keep >= min_steps
    grid steps on the parallel axis when B allows (v7x megacore), grow toward
    target_rows rows per step (MXU row occupancy / per-step overhead)."""
    valid = [nb for nb in range(1, B + 1)
             if B % nb == 0 and ((nb * C) % 8 == 0 or nb == B)]
    best = valid[0]
    for nb in valid:
        if B >= min_steps and B // nb < min_steps:
            continue
        if nb * C * HW * 4 > tile_budget:
            continue
        if best * C >= target_rows and nb > best:
            continue
        best = nb
    return best


# ----------------------------------------------------------------------------- kernel
def _fused_kernel(fs_ref, embw_ref, embb_ref,
                  ca_g_ref, ca_bt_ref, ca_w1_ref, ca_b1_ref, ca_sc_ref, ca_sh_ref,
                  ca_wh_ref, ca_bh_ref, ca_ww_ref, ca_bw_ref,
                  ff_g_ref, ff_bt_ref, ff_w1_ref, ff_b1_ref, ff_w2_ref, ff_b2_ref,
                  avgw_ref, eht_ref, avgh_ref, ewt_ref,
                  o_ref, acc_ref, *, nb, C, H, W, P):
    """One (batch-block i, residual-block j) grid step:
       j == 0            : acc <- patch_to_embedding(forward_seq block)
       every j           : acc <- acc + CA(LN(acc));  acc <- acc + FF(LN(acc))
       j == last         : out <- acc
    Activation layout is lane-dense (nb*C, H*W)."""
    f32 = jnp.float32
    j = pl.program_id(1)

    avgw = avgw_ref[...]   # (HW, H)  block-average over W
    eht = eht_ref[...]     # (H, HW)  0/1 broadcast back over W
    avgh = avgh_ref[...]   # (HW, W)  block-average over H
    ewt = ewt_ref[...]     # (W, HW)  0/1 broadcast back over H

    # ---- patch_to_embedding, once per batch block -----------------------------------
    @pl.when(j == 0)
    def _():
        wemb = embw_ref[...].astype(f32)
        bemb = embb_ref[...].astype(f32)
        for s in range(H):
            xs = fs_ref[:, s * P:(s + 1) * P].astype(f32)
            acc_ref[:, s * W:(s + 1) * W] = (
                jnp.dot(xs, wemb, preferred_element_type=f32) + bemb)

    x = acc_ref[...]                                              # (nbc, HW) residual stream

    def layer_norm(v, g, b):
        # LayerNorm over each length-W lane chunk; moments via factorized skinny MXU
        # dots (replaces the previous dense (HW,HW) ln_avg matrix).
        mean = jnp.dot(jnp.dot(v, avgw, preferred_element_type=f32), eht,
                       preferred_element_type=f32)
        vc = v - mean
        var = jnp.dot(jnp.dot(vc * vc, avgw, preferred_element_type=f32), eht,
                      preferred_element_type=f32)
        return vc * jax.lax.rsqrt(var + LN_EPS) * g + b

    # ---- Residual(PreNorm(CA)) -------------------------------------------------------
    xn = layer_norm(x, ca_g_ref[...], ca_bt_ref[...])
    ph = jnp.dot(xn, avgw, preferred_element_type=f32)            # pool over W -> (nbc, H)
    pw = jnp.dot(xn, avgh, preferred_element_type=f32)            # pool over H -> (nbc, W)

    w1 = ca_w1_ref[...]; b1 = ca_b1_ref[...]                      # (mip, C), (mip, 1)
    sc = ca_sc_ref[...]; sh = ca_sh_ref[...]                      # folded inference-mode BN
    wh = ca_wh_ref[...]; bh = ca_bh_ref[...]                      # (C, mip), (C, 1)
    ww = ca_ww_ref[...]; bw = ca_bw_ref[...]

    def conv_bn_hswish(p):                                        # (C, L) -> (mip, L)
        y = jnp.dot(w1, p, preferred_element_type=f32) + b1
        y = y * sc + sh
        return y * (jnp.clip(y + 3.0, 0.0, 6.0) * (1.0 / 6.0))

    # Per-sample loop for the tiny conv stage -> no O(nb^2) block-diagonal weights.
    ah_rows, aw_rows = [], []
    for ib in range(nb):
        r0, r1 = ib * C, (ib + 1) * C
        yh = conv_bn_hswish(ph[r0:r1, :])                         # (mip, H)
        yw = conv_bn_hswish(pw[r0:r1, :])                         # (mip, W)
        ah_rows.append(jax.nn.sigmoid(jnp.dot(wh, yh, preferred_element_type=f32) + bh))
        aw_rows.append(jax.nn.sigmoid(jnp.dot(ww, yw, preferred_element_type=f32) + bw))
    ah = ah_rows[0] if nb == 1 else jnp.concatenate(ah_rows, axis=0)   # (nbc, H)
    aw = aw_rows[0] if nb == 1 else jnp.concatenate(aw_rows, axis=0)   # (nbc, W)

    a_h = jnp.dot(ah, eht, preferred_element_type=f32)            # broadcast over W -> (nbc, HW)
    a_w = jnp.dot(aw, ewt, preferred_element_type=f32)            # broadcast over H -> (nbc, HW)
    x = x + xn * a_h * a_w                                        # CA identity is LN(x)

    # ---- Residual(PreNorm(FeedForward)) ----------------------------------------------
    xn = layer_norm(x, ff_g_ref[...], ff_bt_ref[...])
    fw1 = ff_w1_ref[...]; fb1 = ff_b1_ref[...]
    fw2 = ff_w2_ref[...]; fb2 = ff_b2_ref[...]
    ff_chunks = []
    for s in range(H):                                            # same W->Dh->W MLP per chunk
        xs = xn[:, s * W:(s + 1) * W]
        hmid = jnp.maximum(jnp.dot(xs, fw1, preferred_element_type=f32) + fb1, 0.0)
        ff_chunks.append(jnp.dot(hmid, fw2, preferred_element_type=f32) + fb2)
    x = x + (ff_chunks[0] if H == 1 else jnp.concatenate(ff_chunks, axis=1))

    acc_ref[...] = x

    @pl.when(j == pl.num_programs(1) - 1)
    def _():
        o_ref[...] = x.astype(o_ref.dtype)


# ----------------------------------------------------------------------------- wrapper
def seq_transformer_ca_forward(forward_seq, prep):
    """forward_seq: (B, n, S, P).  prep: output of prepare_params().  Returns (B, S, dim)."""
    B, C, S, P = forward_seq.shape
    D = prep["emb_w"].shape[1]
    H, W = S, D
    HW = H * W
    NB = prep["ca_w1"].shape[0]

    nb = _pick_batch_block(B, C, HW)
    nbc = nb * C
    fs2 = forward_seq.reshape(B * C, S * P)       # lane-dense HBM layout (row-major reshape)

    xmap = lambda i, j: (i, 0)
    cmap = lambda i, j: (0, 0)
    wmap = lambda i, j: (j, 0, 0)

    in_specs = [pl.BlockSpec((nbc, S * P), xmap),
                pl.BlockSpec(prep["emb_w"].shape, cmap),
                pl.BlockSpec(prep["emb_b"].shape, cmap)]
    in_specs += [pl.BlockSpec((None,) + tuple(prep[k].shape[1:]), wmap) for k in _STACKED]
    in_specs += [pl.BlockSpec(prep[k].shape, cmap) for k in _CONSTS]

    out2 = pl.pallas_call(
        functools.partial(_fused_kernel, nb=nb, C=C, H=H, W=W, P=P),
        out_shape=jax.ShapeDtypeStruct((B * C, HW), forward_seq.dtype),
        grid=(B // nb, NB),
        in_specs=in_specs,
        out_specs=pl.BlockSpec((nbc, HW), xmap),
        scratch_shapes=[pltpu.VMEM((nbc, HW), jnp.float32)],
        compiler_params=pltpu.CompilerParams(
            dimension_semantics=("parallel", "arbitrary"),
            vmem_limit_bytes=32 * 1024 * 1024),
    )(fs2, prep["emb_w"], prep["emb_b"],
      *[prep[k] for k in _STACKED], *[prep[k] for k in _CONSTS])

    return out2.reshape(B, C, S, D)[:, 0]          # to_c_token = Identity


# ------------------------------------------------------------ one-time parameter prep
def prepare_params(params, s_len):
    """Hoisted (one-time) weight stacking / tiling + constant pooling matrices."""
    D = params["embed_w"].shape[1]
    H, W = s_len, D
    HW = H * W
    blocks = [blk for layer in params["layers"] for blk in layer]

    def stack(fn):
        return jnp.stack([fn(b) for b in blocks], axis=0)

    prep = {
        "emb_w": params["embed_w"].astype(jnp.float32),
        "emb_b": params["embed_b"].reshape(1, D).astype(jnp.float32),
        # CA params (LayerNorm gamma/beta tiled across H on the lane axis).
        "ca_ln_g": stack(lambda b: jnp.tile(b["ca"]["ln_g"], H).reshape(1, HW)),
        "ca_ln_b": stack(lambda b: jnp.tile(b["ca"]["ln_b"], H).reshape(1, HW)),
        "ca_w1":   stack(lambda b: b["ca"]["w1"]),
        "ca_b1":   stack(lambda b: b["ca"]["b1"].reshape(-1, 1)),
        "ca_bn_sc": stack(lambda b: b["ca"]["bn_scale"].reshape(-1, 1)),
        "ca_bn_sh": stack(lambda b: b["ca"]["bn_shift"].reshape(-1, 1)),
        "ca_wh":   stack(lambda b: b["ca"]["wh"]),
        "ca_bh":   stack(lambda b: b["ca"]["bh"].reshape(-1, 1)),
        "ca_ww":   stack(lambda b: b["ca"]["ww"]),
        "ca_bw":   stack(lambda b: b["ca"]["bw"].reshape(-1, 1)),
        # FF params.
        "ff_ln_g": stack(lambda b: jnp.tile(b["ff"]["ln_g"], H).reshape(1, HW)),
        "ff_ln_b": stack(lambda b: jnp.tile(b["ff"]["ln_b"], H).reshape(1, HW)),
        "ff_w1":   stack(lambda b: b["ff"]["w1"]),
        "ff_b1":   stack(lambda b: b["ff"]["b1"].reshape(1, -1)),
        "ff_w2":   stack(lambda b: b["ff"]["w2"]),
        "ff_b2":   stack(lambda b: b["ff"]["b2"].reshape(1, -1)),
    }
    # Factorized (skinny) pooling / LN / broadcast matrices for the lane-dense layout.
    eye_h = np.eye(H, dtype=np.float32)
    eye_w = np.eye(W, dtype=np.float32)
    eh = np.kron(eye_h, np.ones((W, 1), np.float32))     # (HW, H): eh[h*W+w, h] = 1
    ew = np.kron(np.ones((H, 1), np.float32), eye_w)     # (HW, W): ew[h*W+w, w] = 1
    prep["avg_w"] = jnp.asarray(eh / W)                  # mean over W per h
    prep["eh_t"] = jnp.asarray(eh.T)                     # broadcast back over W
    prep["avg_h"] = jnp.asarray(ew / H)                  # mean over H per w
    prep["ew_t"] = jnp.asarray(ew.T)                     # broadcast back over H
    return prep


# ----------------------------------------------------- plain-JAX reference (eval mode)
def _layernorm_ref(x, g, b):
    mu = jnp.mean(x, axis=-1, keepdims=True)
    var = jnp.mean(jnp.square(x - mu), axis=-1, keepdims=True)
    return (x - mu) / jnp.sqrt(var + LN_EPS) * g + b


def _ca_ref(z, p):
    H = z.shape[2]
    zh = jnp.mean(z, axis=3)                               # pool_h            -> (B, C, H)
    zw = jnp.mean(z, axis=2)                               # pool_w + permute  -> (B, C, W)
    y = jnp.concatenate([zh, zw], axis=2)                  # (B, C, H+W)
    y = jnp.einsum("mc,bcl->bml", p["w1"], y, precision=PREC) + p["b1"][None, :, None]
    y = y * p["bn_scale"][None, :, None] + p["bn_shift"][None, :, None]
    y = y * jnp.clip(y + 3.0, 0.0, 6.0) / 6.0
    ah = jax.nn.sigmoid(jnp.einsum("cm,bml->bcl", p["wh"], y[:, :, :H], precision=PREC)
                        + p["bh"][None, :, None])
    aw = jax.nn.sigmoid(jnp.einsum("cm,bml->bcl", p["ww"], y[:, :, H:], precision=PREC)
                        + p["bw"][None, :, None])
    return z * aw[:, :, None, :] * ah[:, :, :, None]


def _ff_ref(x, p):
    h = jnp.maximum(jnp.einsum("...d,dh->...h", x, p["w1"], precision=PREC) + p["b1"], 0.0)
    return jnp.einsum("...h,hd->...d", h, p["w2"], precision=PREC) + p["b2"]


def reference_forward(forward_seq, params):
    x = jnp.einsum("bnsp,pd->bnsd", forward_seq, params["embed_w"], precision=PREC) \
        + params["embed_b"]
    for layer in params["layers"]:
        for blk in layer:
            x = x + _ca_ref(_layernorm_ref(x, blk["ca"]["ln_g"], blk["ca"]["ln_b"]), blk["ca"])
            x = x + _ff_ref(_layernorm_ref(x, blk["ff"]["ln_g"], blk["ff"]["ln_b"]), blk["ff"])
    return x[:, 0]


# ----------------------------------------------------------------------------- params
def init_params(key, *, patch_size, dim, depth, mlp_dim, channels=1, reduction=4):
    feat = patch_size * 1 * channels
    mip = max(8, dim // reduction)
    keys = iter(jax.random.split(key, 2 + depth * 3 * 18))
    nrm = lambda k, shp, s=0.2: s * jax.random.normal(k, shp, jnp.float32)

    params = {"embed_w": nrm(next(keys), (feat, dim)),
              "embed_b": nrm(next(keys), (dim,), 0.1),
              "layers": []}
    for _ in range(depth):
        layer = []
        for _ in range(3):
            ln_g = 1.0 + nrm(next(keys), (dim,), 0.1)
            ln_b = nrm(next(keys), (dim,), 0.1)
            w1 = nrm(next(keys), (mip, dim))
            b1 = nrm(next(keys), (mip,), 0.1)
            gamma = 1.0 + nrm(next(keys), (mip,), 0.1)
            beta = nrm(next(keys), (mip,), 0.1)
            rmean = nrm(next(keys), (mip,), 0.1)
            rvar = 1.0 + 0.2 * jax.random.uniform(next(keys), (mip,), jnp.float32)
            scale = gamma / jnp.sqrt(rvar + BN_EPS)   # inference-mode BN folded
            shift = beta - rmean * scale
            ca = dict(ln_g=ln_g, ln_b=ln_b, w1=w1, b1=b1,
                      bn_scale=scale, bn_shift=shift,
                      wh=nrm(next(keys), (dim, mip)), bh=nrm(next(keys), (dim,), 0.1),
                      ww=nrm(next(keys), (dim, mip)), bw=nrm(next(keys), (dim,), 0.1))
            ff = dict(ln_g=1.0 + nrm(next(keys), (dim,), 0.1),
                      ln_b=nrm(next(keys), (dim,), 0.1),
                      w1=nrm(next(keys), (dim, mlp_dim)),
                      b1=nrm(next(keys), (mlp_dim,), 0.1),
                      w2=nrm(next(keys), (mlp_dim, dim)),
                      b2=nrm(next(keys), (dim,), 0.1))
            layer.append(dict(ca=ca, ff=ff))
        params["layers"].append(layer)
    return params


if __name__ == "__main__":
    key = jax.random.PRNGKey(0)
    kp, kx = jax.random.split(key)

    # Small but representative shapes.  The PyTorch module only works when the sequence
    # length n equals `dim` (CA's Conv2d channel count), so n == dim == 16 here.
    batch, dim, seq_len, s_len = 2, 16, 16, 8
    patch_size, depth, heads, mlp_dim = 8, 1, 4, 32   # `heads` is unused by TransformerCA

    params = init_params(kp, patch_size=patch_size, dim=dim, depth=depth, mlp_dim=mlp_dim)
    forward_seq = jax.random.normal(kx, (batch, seq_len, s_len, patch_size), jnp.float32)

    prep = prepare_params(params, s_len)          # one-time weight stacking (hoisted)
    fwd = jax.jit(seq_transformer_ca_forward)
    out = jax.block_until_ready(fwd(forward_seq, prep))
    assert out.shape == (batch, s_len, dim)

    ref = reference_forward(forward_seq, params)
    # Tolerance allows for the default-precision (bf16-pass) f32 MXU dots in the kernel.
    np.testing.assert_allclose(np.asarray(out), np.asarray(ref), rtol=2e-2, atol=2e-2)
    print("KERNEL_OK")
</pallas_src>

<mosaic_0001>
module attributes {stable_mosaic.version = 11 : i64} {
  func.func @_fused_kernel(%arg0: i32, %arg1: i32, %arg2: memref<16x64xf32, #tpu.memory_space<vmem>>, %arg3: memref<8x16xf32, #tpu.memory_space<vmem>>, %arg4: memref<1x16xf32, #tpu.memory_space<vmem>>, %arg5: memref<1x1x128xf32, #tpu.memory_space<vmem>>, %arg6: memref<1x1x128xf32, #tpu.memory_space<vmem>>, %arg7: memref<1x8x16xf32, #tpu.memory_space<vmem>>, %arg8: memref<1x8x1xf32, #tpu.memory_space<vmem>>, %arg9: memref<1x8x1xf32, #tpu.memory_space<vmem>>, %arg10: memref<1x8x1xf32, #tpu.memory_space<vmem>>, %arg11: memref<1x16x8xf32, #tpu.memory_space<vmem>>, %arg12: memref<1x16x1xf32, #tpu.memory_space<vmem>>, %arg13: memref<1x16x8xf32, #tpu.memory_space<vmem>>, %arg14: memref<1x16x1xf32, #tpu.memory_space<vmem>>, %arg15: memref<1x1x128xf32, #tpu.memory_space<vmem>>, %arg16: memref<1x1x128xf32, #tpu.memory_space<vmem>>, %arg17: memref<1x16x32xf32, #tpu.memory_space<vmem>>, %arg18: memref<1x1x32xf32, #tpu.memory_space<vmem>>, %arg19: memref<1x32x16xf32, #tpu.memory_space<vmem>>, %arg20: memref<1x1x16xf32, #tpu.memory_space<vmem>>, %arg21: memref<128x8xf32, #tpu.memory_space<vmem>>, %arg22: memref<8x128xf32, #tpu.memory_space<vmem>>, %arg23: memref<128x16xf32, #tpu.memory_space<vmem>>, %arg24: memref<16x128xf32, #tpu.memory_space<vmem>>, %arg25: memref<16x128xf32, #tpu.memory_space<vmem>>, %arg26: memref<16x128xf32, #tpu.memory_space<vmem>>) attributes {dimension_semantics = [#tpu.dimension_semantics<parallel>, #tpu.dimension_semantics<arbitrary>], iteration_bounds = array<i64: 2, 3>, scalar_prefetch = 0 : i64, scratch_operands = 1 : i64, tpu.core_type = #tpu.core_type<tc>, window_params = [{transform_indices = @transform_0, window_bounds = array<i64: 16, 64>}, {pipeline_mode = #tpu.pipeline_mode<synchronous>, transform_indices = @transform_1, window_bounds = array<i64: 8, 16>}, {pipeline_mode = #tpu.pipeline_mode<synchronous>, transform_indices = @transform_2, window_bounds = array<i64: 1, 16>}, {transform_indices = @transform_3, window_bounds = array<i64: 1, 1, 128>}, {transform_indices = @transform_4, window_bounds = array<i64: 1, 1, 128>}, {transform_indices = @transform_5, window_bounds = array<i64: 1, 8, 16>}, {transform_indices = @transform_6, window_bounds = array<i64: 1, 8, 1>}, {transform_indices = @transform_7, window_bounds = array<i64: 1, 8, 1>}, {transform_indices = @transform_8, window_bounds = array<i64: 1, 8, 1>}, {transform_indices = @transform_9, window_bounds = array<i64: 1, 16, 8>}, {transform_indices = @transform_10, window_bounds = array<i64: 1, 16, 1>}, {transform_indices = @transform_11, window_bounds = array<i64: 1, 16, 8>}, {transform_indices = @transform_12, window_bounds = array<i64: 1, 16, 1>}, {transform_indices = @transform_13, window_bounds = array<i64: 1, 1, 128>}, {transform_indices = @transform_14, window_bounds = array<i64: 1, 1, 128>}, {transform_indices = @transform_15, window_bounds = array<i64: 1, 16, 32>}, {transform_indices = @transform_16, window_bounds = array<i64: 1, 1, 32>}, {transform_indices = @transform_17, window_bounds = array<i64: 1, 32, 16>}, {transform_indices = @transform_18, window_bounds = array<i64: 1, 1, 16>}, {pipeline_mode = #tpu.pipeline_mode<synchronous>, transform_indices = @transform_19, window_bounds = array<i64: 128, 8>}, {pipeline_mode = #tpu.pipeline_mode<synchronous>, transform_indices = @transform_20, window_bounds = array<i64: 8, 128>}, {pipeline_mode = #tpu.pipeline_mode<synchronous>, transform_indices = @transform_21, window_bounds = array<i64: 128, 16>}, {pipeline_mode = #tpu.pipeline_mode<synchronous>, transform_indices = @transform_22, window_bounds = array<i64: 16, 128>}, {transform_indices = @transform_23, window_bounds = array<i64: 16, 128>}]} {
    %c0 = arith.constant 0 : index
    %c0_0 = arith.constant 0 : index
    %0 = vector.load %arg21[%c0, %c0_0] : memref<128x8xf32, #tpu.memory_space<vmem>>, vector<128x8xf32>
    %c0_1 = arith.constant 0 : index
    %c0_2 = arith.constant 0 : index
    %1 = vector.load %arg22[%c0_1, %c0_2] : memref<8x128xf32, #tpu.memory_space<vmem>>, vector<8x128xf32>
    %c0_3 = arith.constant 0 : index
    %c0_4 = arith.constant 0 : index
    %2 = vector.load %arg23[%c0_3, %c0_4] : memref<128x16xf32, #tpu.memory_space<vmem>>, vector<128x16xf32>
    %c0_5 = arith.constant 0 : index
    %c0_6 = arith.constant 0 : index
    %3 = vector.load %arg24[%c0_5, %c0_6] : memref<16x128xf32, #tpu.memory_space<vmem>>, vector<16x128xf32>
    %c0_i32 = arith.constant 0 : i32
    %4 = arith.cmpi eq, %arg1, %c0_i32 : i32
    %5 = arith.extui %4 : i1 to i32
    %c0_i32_7 = arith.constant 0 : i32
    %6 = arith.cmpi ne, %5, %c0_i32_7 : i32
    scf.if %6 {
      %c0_112 = arith.constant 0 : index
      %c0_113 = arith.constant 0 : index
      %201 = vector.load %arg3[%c0_112, %c0_113] : memref<8x16xf32, #tpu.memory_space<vmem>>, vector<8x16xf32>
      %c0_114 = arith.constant 0 : index
      %c0_115 = arith.constant 0 : index
      %202 = vector.load %arg4[%c0_114, %c0_115] : memref<1x16xf32, #tpu.memory_space<vmem>>, vector<1x16xf32>
      %c0_116 = arith.constant 0 : index
      %c0_117 = arith.constant 0 : index
      %203 = vector.load %arg2[%c0_116, %c0_117] : memref<16x64xf32, #tpu.memory_space<vmem>>, vector<16x8xf32>
      %cst_118 = arith.constant dense<0.000000e+00> : vector<16x16xf32>
      %204 = tpu.matmul %203, %201, %cst_118 {dimension_numbers = #tpu.dot_dimension_numbers<[1], [0], [0], [1], [0, 0, 1, 1], [], []>} : vector<16x8xf32>, vector<8x16xf32>, vector<16x16xf32> -> vector<16x16xf32>
      %205 = vector.broadcast %202 : vector<1x16xf32> to vector<16x16xf32>
      %206 = arith.addf %204, %205 : vector<16x16xf32>
      %c0_119 = arith.constant 0 : index
      %c0_120 = arith.constant 0 : index
      %207 = vector.load %arg26[%c0_119, %c0_120] : memref<16x128xf32, #tpu.memory_space<vmem>>, vector<16x16xf32>
      tpu.vector_store %arg26[%c0_119, %c0_120], %206 {strides = array<i32>} : memref<16x128xf32, #tpu.memory_space<vmem>>, vector<16x16xf32>,
      %c0_121 = arith.constant 0 : index
      %c8 = arith.constant 8 : index
      %208 = vector.load %arg2[%c0_121, %c8] : memref<16x64xf32, #tpu.memory_space<vmem>>, vector<16x8xf32>
      %cst_122 = arith.constant dense<0.000000e+00> : vector<16x16xf32>
      %209 = tpu.matmul %208, %201, %cst_122 {dimension_numbers = #tpu.dot_dimension_numbers<[1], [0], [0], [1], [0, 0, 1, 1], [], []>} : vector<16x8xf32>, vector<8x16xf32>, vector<16x16xf32> -> vector<16x16xf32>
      %210 = vector.broadcast %202 : vector<1x16xf32> to vector<16x16xf32>
      %211 = arith.addf %209, %210 : vector<16x16xf32>
      %c0_123 = arith.constant 0 : index
      %c16 = arith.constant 16 : index
      %212 = vector.load %arg26[%c0_123, %c16] : memref<16x128xf32, #tpu.memory_space<vmem>>, vector<16x16xf32>
      tpu.vector_store %arg26[%c0_123, %c16], %211 {strides = array<i32>} : memref<16x128xf32, #tpu.memory_space<vmem>>, vector<16x16xf32>,
      %c0_124 = arith.constant 0 : index
      %c16_125 = arith.constant 16 : index
      %213 = vector.load %arg2[%c0_124, %c16_125] : memref<16x64xf32, #tpu.memory_space<vmem>>, vector<16x8xf32>
      %cst_126 = arith.constant dense<0.000000e+00> : vector<16x16xf32>
      %214 = tpu.matmul %213, %201, %cst_126 {dimension_numbers = #tpu.dot_dimension_numbers<[1], [0], [0], [1], [0, 0, 1, 1], [], []>} : vector<16x8xf32>, vector<8x16xf32>, vector<16x16xf32> -> vector<16x16xf32>
      %215 = vector.broadcast %202 : vector<1x16xf32> to vector<16x16xf32>
      %216 = arith.addf %214, %215 : vector<16x16xf32>
      %c0_127 = arith.constant 0 : index
      %c32 = arith.constant 32 : index
      %217 = vector.load %arg26[%c0_127, %c32] : memref<16x128xf32, #tpu.memory_space<vmem>>, vector<16x16xf32>
      tpu.vector_store %arg26[%c0_127, %c32], %216 {strides = array<i32>} : memref<16x128xf32, #tpu.memory_space<vmem>>, vector<16x16xf32>,
      %c0_128 = arith.constant 0 : index
      %c24 = arith.constant 24 : index
      %218 = vector.load %arg2[%c0_128, %c24] : memref<16x64xf32, #tpu.memory_space<vmem>>, vector<16x8xf32>
      %cst_129 = arith.constant dense<0.000000e+00> : vector<16x16xf32>
      %219 = tpu.matmul %218, %201, %cst_129 {dimension_numbers = #tpu.dot_dimension_numbers<[1], [0], [0], [1], [0, 0, 1, 1], [], []>} : vector<16x8xf32>, vector<8x16xf32>, vector<16x16xf32> -> vector<16x16xf32>
      %220 = vector.broadcast %202 : vector<1x16xf32> to vector<16x16xf32>
      %221 = arith.addf %219, %220 : vector<16x16xf32>
      %c0_130 = arith.constant 0 : index
      %c48 = arith.constant 48 : index
      %222 = vector.load %arg26[%c0_130, %c48] : memref<16x128xf32, #tpu.memory_space<vmem>>, vector<16x16xf32>
      tpu.vector_store %arg26[%c0_130, %c48], %221 {strides = array<i32>} : memref<16x128xf32, #tpu.memory_space<vmem>>, vector<16x16xf32>,
      %c0_131 = arith.constant 0 : index
      %c32_132 = arith.constant 32 : index
      %223 = vector.load %arg2[%c0_131, %c32_132] : memref<16x64xf32, #tpu.memory_space<vmem>>, vector<16x8xf32>
      %cst_133 = arith.constant dense<0.000000e+00> : vector<16x16xf32>
      %224 = tpu.matmul %223, %201, %cst_133 {dimension_numbers = #tpu.dot_dimension_numbers<[1], [0], [0], [1], [0, 0, 1, 1], [], []>} : vector<16x8xf32>, vector<8x16xf32>, vector<16x16xf32> -> vector<16x16xf32>
      %225 = vector.broadcast %202 : vector<1x16xf32> to vector<16x16xf32>
      %226 = arith.addf %224, %225 : vector<16x16xf32>
      %c0_134 = arith.constant 0 : index
      %c64 = arith.constant 64 : index
      %227 = vector.load %arg26[%c0_134, %c64] : memref<16x128xf32, #tpu.memory_space<vmem>>, vector<16x16xf32>
      tpu.vector_store %arg26[%c0_134, %c64], %226 {strides = array<i32>} : memref<16x128xf32, #tpu.memory_space<vmem>>, vector<16x16xf32>,
      %c0_135 = arith.constant 0 : index
      %c40 = arith.constant 40 : index
      %228 = vector.load %arg2[%c0_135, %c40] : memref<16x64xf32, #tpu.memory_space<vmem>>, vector<16x8xf32>
      %cst_136 = arith.constant dense<0.000000e+00> : vector<16x16xf32>
      %229 = tpu.matmul %228, %201, %cst_136 {dimension_numbers = #tpu.dot_dimension_numbers<[1], [0], [0], [1], [0, 0, 1, 1], [], []>} : vector<16x8xf32>, vector<8x16xf32>, vector<16x16xf32> -> vector<16x16xf32>
      %230 = vector.broadcast %202 : vector<1x16xf32> to vector<16x16xf32>
      %231 = arith.addf %229, %230 : vector<16x16xf32>
      %c0_137 = arith.constant 0 : index
      %c80 = arith.constant 80 : index
      %232 = vector.load %arg26[%c0_137, %c80] : memref<16x128xf32, #tpu.memory_space<vmem>>, vector<16x16xf32>
      tpu.vector_store %arg26[%c0_137, %c80], %231 {strides = array<i32>} : memref<16x128xf32, #tpu.memory_space<vmem>>, vector<16x16xf32>,
      %c0_138 = arith.constant 0 : index
      %c48_139 = arith.constant 48 : index
      %233 = vector.load %arg2[%c0_138, %c48_139] : memref<16x64xf32, #tpu.memory_space<vmem>>, vector<16x8xf32>
      %cst_140 = arith.constant dense<0.000000e+00> : vector<16x16xf32>
      %234 = tpu.matmul %233, %201, %cst_140 {dimension_numbers = #tpu.dot_dimension_numbers<[1], [0], [0], [1], [0, 0, 1, 1], [], []>} : vector<16x8xf32>, vector<8x16xf32>, vector<16x16xf32> -> vector<16x16xf32>
      %235 = vector.broadcast %202 : vector<1x16xf32> to vector<16x16xf32>
      %236 = arith.addf %234, %235 : vector<16x16xf32>
      %c0_141 = arith.constant 0 : index
      %c96 = arith.constant 96 : index
      %237 = vector.load %arg26[%c0_141, %c96] : memref<16x128xf32, #tpu.memory_space<vmem>>, vector<16x16xf32>
      tpu.vector_store %arg26[%c0_141, %c96], %236 {strides = array<i32>} : memref<16x128xf32, #tpu.memory_space<vmem>>, vector<16x16xf32>,
      %c0_142 = arith.constant 0 : index
      %c56 = arith.constant 56 : index
      %238 = vector.load %arg2[%c0_142, %c56] : memref<16x64xf32, #tpu.memory_space<vmem>>, vector<16x8xf32>
      %cst_143 = arith.constant dense<0.000000e+00> : vector<16x16xf32>
      %239 = tpu.matmul %238, %201, %cst_143 {dimension_numbers = #tpu.dot_dimension_numbers<[1], [0], [0], [1], [0, 0, 1, 1], [], []>} : vector<16x8xf32>, vector<8x16xf32>, vector<16x16xf32> -> vector<16x16xf32>
      %240 = vector.broadcast %202 : vector<1x16xf32> to vector<16x16xf32>
      %241 = arith.addf %239, %240 : vector<16x16xf32>
      %c0_144 = arith.constant 0 : index
      %c112 = arith.constant 112 : index
      %242 = vector.load %arg26[%c0_144, %c112] : memref<16x128xf32, #tpu.memory_space<vmem>>, vector<16x16xf32>
      tpu.vector_store %arg26[%c0_144, %c112], %241 {strides = array<i32>} : memref<16x128xf32, #tpu.memory_space<vmem>>, vector<16x16xf32>,
    } else {
    }
    %c0_8 = arith.constant 0 : index
    %c0_9 = arith.constant 0 : index
    %7 = vector.load %arg26[%c0_8, %c0_9] : memref<16x128xf32, #tpu.memory_space<vmem>>, vector<16x128xf32>
    %c0_10 = arith.constant 0 : index
    %c0_11 = arith.constant 0 : index
    %c0_12 = arith.constant 0 : index
    %8 = vector.load %arg5[%c0_10, %c0_11, %c0_12] : memref<1x1x128xf32, #tpu.memory_space<vmem>>, vector<1x1x128xf32>
    %9 = vector.shape_cast %8 : vector<1x1x128xf32> to vector<1x128xf32>
    %c0_13 = arith.constant 0 : index
    %c0_14 = arith.constant 0 : index
    %c0_15 = arith.constant 0 : index
    %10 = vector.load %arg6[%c0_13, %c0_14, %c0_15] : memref<1x1x128xf32, #tpu.memory_space<vmem>>, vector<1x1x128xf32>
    %11 = vector.shape_cast %10 : vector<1x1x128xf32> to vector<1x128xf32>
    %cst = arith.constant dense<0.000000e+00> : vector<16x8xf32>
    %12 = tpu.matmul %7, %0, %cst {dimension_numbers = #tpu.dot_dimension_numbers<[1], [0], [0], [1], [0, 0, 1, 1], [], []>} : vector<16x128xf32>, vector<128x8xf32>, vector<16x8xf32> -> vector<16x8xf32>
    %cst_16 = arith.constant dense<0.000000e+00> : vector<16x128xf32>
    %13 = tpu.matmul %12, %1, %cst_16 {dimension_numbers = #tpu.dot_dimension_numbers<[1], [0], [0], [1], [0, 0, 1, 1], [], []>} : vector<16x8xf32>, vector<8x128xf32>, vector<16x128xf32> -> vector<16x128xf32>
    %14 = arith.subf %7, %13 : vector<16x128xf32>
    %15 = arith.mulf %14, %14 : vector<16x128xf32>
    %cst_17 = arith.constant dense<0.000000e+00> : vector<16x8xf32>
    %16 = tpu.matmul %15, %0, %cst_17 {dimension_numbers = #tpu.dot_dimension_numbers<[1], [0], [0], [1], [0, 0, 1, 1], [], []>} : vector<16x128xf32>, vector<128x8xf32>, vector<16x8xf32> -> vector<16x8xf32>
    %cst_18 = arith.constant dense<0.000000e+00> : vector<16x128xf32>
    %17 = tpu.matmul %16, %1, %cst_18 {dimension_numbers = #tpu.dot_dimension_numbers<[1], [0], [0], [1], [0, 0, 1, 1], [], []>} : vector<16x8xf32>, vector<8x128xf32>, vector<16x128xf32> -> vector<16x128xf32>
    %cst_19 = arith.constant 9.99999974E-6 : f32
    %18 = vector.broadcast %cst_19 : f32 to vector<16x128xf32>
    %19 = arith.addf %17, %18 : vector<16x128xf32>
    %20 = math.rsqrt %19 : vector<16x128xf32>
    %21 = arith.mulf %14, %20 : vector<16x128xf32>
    %22 = vector.broadcast %9 : vector<1x128xf32> to vector<16x128xf32>
    %23 = arith.mulf %21, %22 : vector<16x128xf32>
    %24 = vector.broadcast %11 : vector<1x128xf32> to vector<16x128xf32>
    %25 = arith.addf %23, %24 : vector<16x128xf32>
    %cst_20 = arith.constant dense<0.000000e+00> : vector<16x8xf32>
    %26 = tpu.matmul %25, %0, %cst_20 {dimension_numbers = #tpu.dot_dimension_numbers<[1], [0], [0], [1], [0, 0, 1, 1], [], []>} : vector<16x128xf32>, vector<128x8xf32>, vector<16x8xf32> -> vector<16x8xf32>
    %cst_21 = arith.constant dense<0.000000e+00> : vector<16x16xf32>
    %27 = tpu.matmul %25, %2, %cst_21 {dimension_numbers = #tpu.dot_dimension_numbers<[1], [0], [0], [1], [0, 0, 1, 1], [], []>} : vector<16x128xf32>, vector<128x16xf32>, vector<16x16xf32> -> vector<16x16xf32>
    %c0_22 = arith.constant 0 : index
    %c0_23 = arith.constant 0 : index
    %c0_24 = arith.constant 0 : index
    %28 = vector.load %arg7[%c0_22, %c0_23, %c0_24] : memref<1x8x16xf32, #tpu.memory_space<vmem>>, vector<1x8x16xf32>
    %29 = vector.shape_cast %28 : vector<1x8x16xf32> to vector<8x16xf32>
    %c0_25 = arith.constant 0 : index
    %c0_26 = arith.constant 0 : index
    %c0_27 = arith.constant 0 : index
    %30 = vector.load %arg8[%c0_25, %c0_26, %c0_27] : memref<1x8x1xf32, #tpu.memory_space<vmem>>, vector<1x8x1xf32>
    %31 = vector.shape_cast %30 : vector<1x8x1xf32> to vector<8x1xf32>
    %c0_28 = arith.constant 0 : index
    %c0_29 = arith.constant 0 : index
    %c0_30 = arith.constant 0 : index
    %32 = vector.load %arg9[%c0_28, %c0_29, %c0_30] : memref<1x8x1xf32, #tpu.memory_space<vmem>>, vector<1x8x1xf32>
    %33 = vector.shape_cast %32 : vector<1x8x1xf32> to vector<8x1xf32>
    %c0_31 = arith.constant 0 : index
    %c0_32 = arith.constant 0 : index
    %c0_33 = arith.constant 0 : index
    %34 = vector.load %arg10[%c0_31, %c0_32, %c0_33] : memref<1x8x1xf32, #tpu.memory_space<vmem>>, vector<1x8x1xf32>
    %35 = vector.shape_cast %34 : vector<1x8x1xf32> to vector<8x1xf32>
    %c0_34 = arith.constant 0 : index
    %c0_35 = arith.constant 0 : index
    %c0_36 = arith.constant 0 : index
    %36 = vector.load %arg11[%c0_34, %c0_35, %c0_36] : memref<1x16x8xf32, #tpu.memory_space<vmem>>, vector<1x16x8xf32>
    %37 = vector.shape_cast %36 : vector<1x16x8xf32> to vector<16x8xf32>
    %c0_37 = arith.constant 0 : index
    %c0_38 = arith.constant 0 : index
    %c0_39 = arith.constant 0 : index
    %38 = vector.load %arg12[%c0_37, %c0_38, %c0_39] : memref<1x16x1xf32, #tpu.memory_space<vmem>>, vector<1x16x1xf32>
    %39 = vector.shape_cast %38 : vector<1x16x1xf32> to vector<16x1xf32>
    %c0_40 = arith.constant 0 : index
    %c0_41 = arith.constant 0 : index
    %c0_42 = arith.constant 0 : index
    %40 = vector.load %arg13[%c0_40, %c0_41, %c0_42] : memref<1x16x8xf32, #tpu.memory_space<vmem>>, vector<1x16x8xf32>
    %41 = vector.shape_cast %40 : vector<1x16x8xf32> to vector<16x8xf32>
    %c0_43 = arith.constant 0 : index
    %c0_44 = arith.constant 0 : index
    %c0_45 = arith.constant 0 : index
    %42 = vector.load %arg14[%c0_43, %c0_44, %c0_45] : memref<1x16x1xf32, #tpu.memory_space<vmem>>, vector<1x16x1xf32>
    %43 = vector.shape_cast %42 : vector<1x16x1xf32> to vector<16x1xf32>
    %cst_46 = arith.constant dense<0.000000e+00> : vector<8x8xf32>
    %44 = tpu.matmul %29, %26, %cst_46 {dimension_numbers = #tpu.dot_dimension_numbers<[1], [0], [0], [1], [0, 0, 1, 1], [], []>} : vector<8x16xf32>, vector<16x8xf32>, vector<8x8xf32> -> vector<8x8xf32>
    %45 = vector.broadcast %31 : vector<8x1xf32> to vector<8x8xf32>
    %46 = arith.addf %44, %45 : vector<8x8xf32>
    %47 = vector.broadcast %33 : vector<8x1xf32> to vector<8x8xf32>
    %48 = arith.mulf %46, %47 : vector<8x8xf32>
    %49 = vector.broadcast %35 : vector<8x1xf32> to vector<8x8xf32>
    %50 = arith.addf %48, %49 : vector<8x8xf32>
    %cst_47 = arith.constant 3.000000e+00 : f32
    %51 = vector.broadcast %cst_47 : f32 to vector<8x8xf32>
    %52 = arith.addf %50, %51 : vector<8x8xf32>
    %cst_48 = arith.constant 0.000000e+00 : f32
    %cst_49 = arith.constant 6.000000e+00 : f32
    %53 = vector.broadcast %cst_48 : f32 to vector<8x8xf32>
    %54 = arith.maximumf %53, %52 : vector<8x8xf32>
    %55 = vector.broadcast %cst_49 : f32 to vector<8x8xf32>
    %56 = arith.minimumf %55, %54 : vector<8x8xf32>
    %cst_50 = arith.constant 0.166666672 : f32
    %57 = vector.broadcast %cst_50 : f32 to vector<8x8xf32>
    %58 = arith.mulf %56, %57 : vector<8x8xf32>
    %59 = arith.mulf %50, %58 : vector<8x8xf32>
    %cst_51 = arith.constant dense<0.000000e+00> : vector<8x16xf32>
    %60 = tpu.matmul %29, %27, %cst_51 {dimension_numbers = #tpu.dot_dimension_numbers<[1], [0], [0], [1], [0, 0, 1, 1], [], []>} : vector<8x16xf32>, vector<16x16xf32>, vector<8x16xf32> -> vector<8x16xf32>
    %61 = vector.broadcast %31 : vector<8x1xf32> to vector<8x16xf32>
    %62 = arith.addf %60, %61 : vector<8x16xf32>
    %63 = vector.broadcast %33 : vector<8x1xf32> to vector<8x16xf32>
    %64 = arith.mulf %62, %63 : vector<8x16xf32>
    %65 = vector.broadcast %35 : vector<8x1xf32> to vector<8x16xf32>
    %66 = arith.addf %64, %65 : vector<8x16xf32>
    %cst_52 = arith.constant 3.000000e+00 : f32
    %67 = vector.broadcast %cst_52 : f32 to vector<8x16xf32>
    %68 = arith.addf %66, %67 : vector<8x16xf32>
    %cst_53 = arith.constant 0.000000e+00 : f32
    %cst_54 = arith.constant 6.000000e+00 : f32
    %69 = vector.broadcast %cst_53 : f32 to vector<8x16xf32>
    %70 = arith.maximumf %69, %68 : vector<8x16xf32>
    %71 = vector.broadcast %cst_54 : f32 to vector<8x16xf32>
    %72 = arith.minimumf %71, %70 : vector<8x16xf32>
    %cst_55 = arith.constant 0.166666672 : f32
    %73 = vector.broadcast %cst_55 : f32 to vector<8x16xf32>
    %74 = arith.mulf %72, %73 : vector<8x16xf32>
    %75 = arith.mulf %66, %74 : vector<8x16xf32>
    %cst_56 = arith.constant dense<0.000000e+00> : vector<16x8xf32>
    %76 = tpu.matmul %37, %59, %cst_56 {dimension_numbers = #tpu.dot_dimension_numbers<[1], [0], [0], [1], [0, 0, 1, 1], [], []>} : vector<16x8xf32>, vector<8x8xf32>, vector<16x8xf32> -> vector<16x8xf32>
    %77 = vector.broadcast %39 : vector<16x1xf32> to vector<16x8xf32>
    %78 = arith.addf %76, %77 : vector<16x8xf32>
    %79 = arith.negf %78 : vector<16x8xf32>
    %80 = math.exp %79 : vector<16x8xf32>
    %cst_57 = arith.constant 1.000000e+00 : f32
    %81 = vector.broadcast %cst_57 : f32 to vector<16x8xf32>
    %82 = arith.addf %81, %80 : vector<16x8xf32>
    %83 = arith.divf %81, %82 : vector<16x8xf32>
    %cst_58 = arith.constant dense<0.000000e+00> : vector<16x16xf32>
    %84 = tpu.matmul %41, %75, %cst_58 {dimension_numbers = #tpu.dot_dimension_numbers<[1], [0], [0], [1], [0, 0, 1, 1], [], []>} : vector<16x8xf32>, vector<8x16xf32>, vector<16x16xf32> -> vector<16x16xf32>
    %85 = vector.broadcast %43 : vector<16x1xf32> to vector<16x16xf32>
    %86 = arith.addf %84, %85 : vector<16x16xf32>
    %87 = arith.negf %86 : vector<16x16xf32>
    %88 = math.exp %87 : vector<16x16xf32>
    %cst_59 = arith.constant 1.000000e+00 : f32
    %89 = vector.broadcast %cst_59 : f32 to vector<16x16xf32>
    %90 = arith.addf %89, %88 : vector<16x16xf32>
    %91 = arith.divf %89, %90 : vector<16x16xf32>
    %cst_60 = arith.constant dense<0.000000e+00> : vector<16x128xf32>
    %92 = tpu.matmul %83, %1, %cst_60 {dimension_numbers = #tpu.dot_dimension_numbers<[1], [0], [0], [1], [0, 0, 1, 1], [], []>} : vector<16x8xf32>, vector<8x128xf32>, vector<16x128xf32> -> vector<16x128xf32>
    %cst_61 = arith.constant dense<0.000000e+00> : vector<16x128xf32>
    %93 = tpu.matmul %91, %3, %cst_61 {dimension_numbers = #tpu.dot_dimension_numbers<[1], [0], [0], [1], [0, 0, 1, 1], [], []>} : vector<16x16xf32>, vector<16x128xf32>, vector<16x128xf32> -> vector<16x128xf32>
    %94 = arith.mulf %25, %92 : vector<16x128xf32>
    %95 = arith.mulf %94, %93 : vector<16x128xf32>
    %96 = arith.addf %7, %95 : vector<16x128xf32>
    %c0_62 = arith.constant 0 : index
    %c0_63 = arith.constant 0 : index
    %c0_64 = arith.constant 0 : index
    %97 = vector.load %arg15[%c0_62, %c0_63, %c0_64] : memref<1x1x128xf32, #tpu.memory_space<vmem>>, vector<1x1x128xf32>
    %98 = vector.shape_cast %97 : vector<1x1x128xf32> to vector<1x128xf32>
    %c0_65 = arith.constant 0 : index
    %c0_66 = arith.constant 0 : index
    %c0_67 = arith.constant 0 : index
    %99 = vector.load %arg16[%c0_65, %c0_66, %c0_67] : memref<1x1x128xf32, #tpu.memory_space<vmem>>, vector<1x1x128xf32>
    %100 = vector.shape_cast %99 : vector<1x1x128xf32> to vector<1x128xf32>
    %cst_68 = arith.constant dense<0.000000e+00> : vector<16x8xf32>
    %101 = tpu.matmul %96, %0, %cst_68 {dimension_numbers = #tpu.dot_dimension_numbers<[1], [0], [0], [1], [0, 0, 1, 1], [], []>} : vector<16x128xf32>, vector<128x8xf32>, vector<16x8xf32> -> vector<16x8xf32>
    %cst_69 = arith.constant dense<0.000000e+00> : vector<16x128xf32>
    %102 = tpu.matmul %101, %1, %cst_69 {dimension_numbers = #tpu.dot_dimension_numbers<[1], [0], [0], [1], [0, 0, 1, 1], [], []>} : vector<16x8xf32>, vector<8x128xf32>, vector<16x128xf32> -> vector<16x128xf32>
    %103 = arith.subf %96, %102 : vector<16x128xf32>
    %104 = arith.mulf %103, %103 : vector<16x128xf32>
    %cst_70 = arith.constant dense<0.000000e+00> : vector<16x8xf32>
    %105 = tpu.matmul %104, %0, %cst_70 {dimension_numbers = #tpu.dot_dimension_numbers<[1], [0], [0], [1], [0, 0, 1, 1], [], []>} : vector<16x128xf32>, vector<128x8xf32>, vector<16x8xf32> -> vector<16x8xf32>
    %cst_71 = arith.constant dense<0.000000e+00> : vector<16x128xf32>
    %106 = tpu.matmul %105, %1, %cst_71 {dimension_numbers = #tpu.dot_dimension_numbers<[1], [0], [0], [1], [0, 0, 1, 1], [], []>} : vector<16x8xf32>, vector<8x128xf32>, vector<16x128xf32> -> vector<16x128xf32>
    %cst_72 = arith.constant 9.99999974E-6 : f32
    %107 = vector.broadcast %cst_72 : f32 to vector<16x128xf32>
    %108 = arith.addf %106, %107 : vector<16x128xf32>
    %109 = math.rsqrt %108 : vector<16x128xf32>
    %110 = arith.mulf %103, %109 : vector<16x128xf32>
    %111 = vector.broadcast %98 : vector<1x128xf32> to vector<16x128xf32>
    %112 = arith.mulf %110, %111 : vector<16x128xf32>
    %113 = vector.broadcast %100 : vector<1x128xf32> to vector<16x128xf32>
    %114 = arith.addf %112, %113 : vector<16x128xf32>
    %c0_73 = arith.constant 0 : index
    %c0_74 = arith.constant 0 : index
    %c0_75 = arith.constant 0 : index
    %115 = vector.load %arg17[%c0_73, %c0_74, %c0_75] : memref<1x16x32xf32, #tpu.memory_space<vmem>>, vector<1x16x32xf32>
    %116 = vector.shape_cast %115 : vector<1x16x32xf32> to vector<16x32xf32>
    %c0_76 = arith.constant 0 : index
    %c0_77 = arith.constant 0 : index
    %c0_78 = arith.constant 0 : index
    %117 = vector.load %arg18[%c0_76, %c0_77, %c0_78] : memref<1x1x32xf32, #tpu.memory_space<vmem>>, vector<1x1x32xf32>
    %118 = vector.shape_cast %117 : vector<1x1x32xf32> to vector<1x32xf32>
    %c0_79 = arith.constant 0 : index
    %c0_80 = arith.constant 0 : index
    %c0_81 = arith.constant 0 : index
    %119 = vector.load %arg19[%c0_79, %c0_80, %c0_81] : memref<1x32x16xf32, #tpu.memory_space<vmem>>, vector<1x32x16xf32>
    %120 = vector.shape_cast %119 : vector<1x32x16xf32> to vector<32x16xf32>
    %c0_82 = arith.constant 0 : index
    %c0_83 = arith.constant 0 : index
    %c0_84 = arith.constant 0 : index
    %121 = vector.load %arg20[%c0_82, %c0_83, %c0_84] : memref<1x1x16xf32, #tpu.memory_space<vmem>>, vector<1x1x16xf32>
    %122 = vector.shape_cast %121 : vector<1x1x16xf32> to vector<1x16xf32>
    %123 = vector.extract_strided_slice %114 {offsets = [0, 0], sizes = [16, 16], strides = [1, 1]} : vector<16x128xf32> to vector<16x16xf32>
    %cst_85 = arith.constant dense<0.000000e+00> : vector<16x32xf32>
    %124 = tpu.matmul %123, %116, %cst_85 {dimension_numbers = #tpu.dot_dimension_numbers<[1], [0], [0], [1], [0, 0, 1, 1], [], []>} : vector<16x16xf32>, vector<16x32xf32>, vector<16x32xf32> -> vector<16x32xf32>
    %125 = vector.broadcast %118 : vector<1x32xf32> to vector<16x32xf32>
    %126 = arith.addf %124, %125 : vector<16x32xf32>
    %cst_86 = arith.constant 0.000000e+00 : f32
    %127 = vector.broadcast %cst_86 : f32 to vector<16x32xf32>
    %128 = arith.maximumf %126, %127 : vector<16x32xf32>
    %cst_87 = arith.constant dense<0.000000e+00> : vector<16x16xf32>
    %129 = tpu.matmul %128, %120, %cst_87 {dimension_numbers = #tpu.dot_dimension_numbers<[1], [0], [0], [1], [0, 0, 1, 1], [], []>} : vector<16x32xf32>, vector<32x16xf32>, vector<16x16xf32> -> vector<16x16xf32>
    %130 = vector.broadcast %122 : vector<1x16xf32> to vector<16x16xf32>
    %131 = arith.addf %129, %130 : vector<16x16xf32>
    %132 = vector.extract_strided_slice %114 {offsets = [0, 16], sizes = [16, 16], strides = [1, 1]} : vector<16x128xf32> to vector<16x16xf32>
    %cst_88 = arith.constant dense<0.000000e+00> : vector<16x32xf32>
    %133 = tpu.matmul %132, %116, %cst_88 {dimension_numbers = #tpu.dot_dimension_numbers<[1], [0], [0], [1], [0, 0, 1, 1], [], []>} : vector<16x16xf32>, vector<16x32xf32>, vector<16x32xf32> -> vector<16x32xf32>
    %134 = vector.broadcast %118 : vector<1x32xf32> to vector<16x32xf32>
    %135 = arith.addf %133, %134 : vector<16x32xf32>
    %cst_89 = arith.constant 0.000000e+00 : f32
    %136 = vector.broadcast %cst_89 : f32 to vector<16x32xf32>
    %137 = arith.maximumf %135, %136 : vector<16x32xf32>
    %cst_90 = arith.constant dense<0.000000e+00> : vector<16x16xf32>
    %138 = tpu.matmul %137, %120, %cst_90 {dimension_numbers = #tpu.dot_dimension_numbers<[1], [0], [0], [1], [0, 0, 1, 1], [], []>} : vector<16x32xf32>, vector<32x16xf32>, vector<16x16xf32> -> vector<16x16xf32>
    %139 = vector.broadcast %122 : vector<1x16xf32> to vector<16x16xf32>
    %140 = arith.addf %138, %139 : vector<16x16xf32>
    %141 = vector.extract_strided_slice %114 {offsets = [0, 32], sizes = [16, 16], strides = [1, 1]} : vector<16x128xf32> to vector<16x16xf32>
    %cst_91 = arith.constant dense<0.000000e+00> : vector<16x32xf32>
    %142 = tpu.matmul %141, %116, %cst_91 {dimension_numbers = #tpu.dot_dimension_numbers<[1], [0], [0], [1], [0, 0, 1, 1], [], []>} : vector<16x16xf32>, vector<16x32xf32>, vector<16x32xf32> -> vector<16x32xf32>
    %143 = vector.broadcast %118 : vector<1x32xf32> to vector<16x32xf32>
    %144 = arith.addf %142, %143 : vector<16x32xf32>
    %cst_92 = arith.constant 0.000000e+00 : f32
    %145 = vector.broadcast %cst_92 : f32 to vector<16x32xf32>
    %146 = arith.maximumf %144, %145 : vector<16x32xf32>
    %cst_93 = arith.constant dense<0.000000e+00> : vector<16x16xf32>
    %147 = tpu.matmul %146, %120, %cst_93 {dimension_numbers = #tpu.dot_dimension_numbers<[1], [0], [0], [1], [0, 0, 1, 1], [], []>} : vector<16x32xf32>, vector<32x16xf32>, vector<16x16xf32> -> vector<16x16xf32>
    %148 = vector.broadcast %122 : vector<1x16xf32> to vector<16x16xf32>
    %149 = arith.addf %147, %148 : vector<16x16xf32>
    %150 = vector.extract_strided_slice %114 {offsets = [0, 48], sizes = [16, 16], strides = [1, 1]} : vector<16x128xf32> to vector<16x16xf32>
    %cst_94 = arith.constant dense<0.000000e+00> : vector<16x32xf32>
    %151 = tpu.matmul %150, %116, %cst_94 {dimension_numbers = #tpu.dot_dimension_numbers<[1], [0], [0], [1], [0, 0, 1, 1], [], []>} : vector<16x16xf32>, vector<16x32xf32>, vector<16x32xf32> -> vector<16x32xf32>
    %152 = vector.broadcast %118 : vector<1x32xf32> to vector<16x32xf32>
    %153 = arith.addf %151, %152 : vector<16x32xf32>
    %cst_95 = arith.constant 0.000000e+00 : f32
    %154 = vector.broadcast %cst_95 : f32 to vector<16x32xf32>
    %155 = arith.maximumf %153, %154 : vector<16x32xf32>
    %cst_96 = arith.constant dense<0.000000e+00> : vector<16x16xf32>
    %156 = tpu.matmul %155, %120, %cst_96 {dimension_numbers = #tpu.dot_dimension_numbers<[1], [0], [0], [1], [0, 0, 1, 1], [], []>} : vector<16x32xf32>, vector<32x16xf32>, vector<16x16xf32> -> vector<16x16xf32>
    %157 = vector.broadcast %122 : vector<1x16xf32> to vector<16x16xf32>
    %158 = arith.addf %156, %157 : vector<16x16xf32>
    %159 = vector.extract_strided_slice %114 {offsets = [0, 64], sizes = [16, 16], strides = [1, 1]} : vector<16x128xf32> to vector<16x16xf32>
    %cst_97 = arith.constant dense<0.000000e+00> : vector<16x32xf32>
    %160 = tpu.matmul %159, %116, %cst_97 {dimension_numbers = #tpu.dot_dimension_numbers<[1], [0], [0], [1], [0, 0, 1, 1], [], []>} : vector<16x16xf32>, vector<16x32xf32>, vector<16x32xf32> -> vector<16x32xf32>
    %161 = vector.broadcast %118 : vector<1x32xf32> to vector<16x32xf32>
    %162 = arith.addf %160, %161 : vector<16x32xf32>
    %cst_98 = arith.constant 0.000000e+00 : f32
    %163 = vector.broadcast %cst_98 : f32 to vector<16x32xf32>
    %164 = arith.maximumf %162, %163 : vector<16x32xf32>
    %cst_99 = arith.constant dense<0.000000e+00> : vector<16x16xf32>
    %165 = tpu.matmul %164, %120, %cst_99 {dimension_numbers = #tpu.dot_dimension_numbers<[1], [0], [0], [1], [0, 0, 1, 1], [], []>} : vector<16x32xf32>, vector<32x16xf32>, vector<16x16xf32> -> vector<16x16xf32>
    %166 = vector.broadcast %122 : vector<1x16xf32> to vector<16x16xf32>
    %167 = arith.addf %165, %166 : vector<16x16xf32>
    %168 = vector.extract_strided_slice %114 {offsets = [0, 80], sizes = [16, 16], strides = [1, 1]} : vector<16x128xf32> to vector<16x16xf32>
    %cst_100 = arith.constant dense<0.000000e+00> : vector<16x32xf32>
    %169 = tpu.matmul %168, %116, %cst_100 {dimension_numbers = #tpu.dot_dimension_numbers<[1], [0], [0], [1], [0, 0, 1, 1], [], []>} : vector<16x16xf32>, vector<16x32xf32>, vector<16x32xf32> -> vector<16x32xf32>
    %170 = vector.broadcast %118 : vector<1x32xf32> to vector<16x32xf32>
    %171 = arith.addf %169, %170 : vector<16x32xf32>
    %cst_101 = arith.constant 0.000000e+00 : f32
    %172 = vector.broadcast %cst_101 : f32 to vector<16x32xf32>
    %173 = arith.maximumf %171, %172 : vector<16x32xf32>
    %cst_102 = arith.constant dense<0.000000e+00> : vector<16x16xf32>
    %174 = tpu.matmul %173, %120, %cst_102 {dimension_numbers = #tpu.dot_dimension_numbers<[1], [0], [0], [1], [0, 0, 1, 1], [], []>} : vector<16x32xf32>, vector<32x16xf32>, vector<16x16xf32> -> vector<16x16xf32>
    %175 = vector.broadcast %122 : vector<1x16xf32> to vector<16x16xf32>
    %176 = arith.addf %174, %175 : vector<16x16xf32>
    %177 = vector.extract_strided_slice %114 {offsets = [0, 96], sizes = [16, 16], strides = [1, 1]} : vector<16x128xf32> to vector<16x16xf32>
    %cst_103 = arith.constant dense<0.000000e+00> : vector<16x32xf32>
    %178 = tpu.matmul %177, %116, %cst_103 {dimension_numbers = #tpu.dot_dimension_numbers<[1], [0], [0], [1], [0, 0, 1, 1], [], []>} : vector<16x16xf32>, vector<16x32xf32>, vector<16x32xf32> -> vector<16x32xf32>
    %179 = vector.broadcast %118 : vector<1x32xf32> to vector<16x32xf32>
    %180 = arith.addf %178, %179 : vector<16x32xf32>
    %cst_104 = arith.constant 0.000000e+00 : f32
    %181 = vector.broadcast %cst_104 : f32 to vector<16x32xf32>
    %182 = arith.maximumf %180, %181 : vector<16x32xf32>
    %cst_105 = arith.constant dense<0.000000e+00> : vector<16x16xf32>
    %183 = tpu.matmul %182, %120, %cst_105 {dimension_numbers = #tpu.dot_dimension_numbers<[1], [0], [0], [1], [0, 0, 1, 1], [], []>} : vector<16x32xf32>, vector<32x16xf32>, vector<16x16xf32> -> vector<16x16xf32>
    %184 = vector.broadcast %122 : vector<1x16xf32> to vector<16x16xf32>
    %185 = arith.addf %183, %184 : vector<16x16xf32>
    %186 = vector.extract_strided_slice %114 {offsets = [0, 112], sizes = [16, 16], strides = [1, 1]} : vector<16x128xf32> to vector<16x16xf32>
    %cst_106 = arith.constant dense<0.000000e+00> : vector<16x32xf32>
    %187 = tpu.matmul %186, %116, %cst_106 {dimension_numbers = #tpu.dot_dimension_numbers<[1], [0], [0], [1], [0, 0, 1, 1], [], []>} : vector<16x16xf32>, vector<16x32xf32>, vector<16x32xf32> -> vector<16x32xf32>
    %188 = vector.broadcast %118 : vector<1x32xf32> to vector<16x32xf32>
    %189 = arith.addf %187, %188 : vector<16x32xf32>
    %cst_107 = arith.constant 0.000000e+00 : f32
    %190 = vector.broadcast %cst_107 : f32 to vector<16x32xf32>
    %191 = arith.maximumf %189, %190 : vector<16x32xf32>
    %cst_108 = arith.constant dense<0.000000e+00> : vector<16x16xf32>
    %192 = tpu.matmul %191, %120, %cst_108 {dimension_numbers = #tpu.dot_dimension_numbers<[1], [0], [0], [1], [0, 0, 1, 1], [], []>} : vector<16x32xf32>, vector<32x16xf32>, vector<16x16xf32> -> vector<16x16xf32>
    %193 = vector.broadcast %122 : vector<1x16xf32> to vector<16x16xf32>
    %194 = arith.addf %192, %193 : vector<16x16xf32>
    %195 = tpu.concatenate %131, %140, %149, %158, %167, %176, %185, %194 in 1 : vector<16x16xf32>, vector<16x16xf32>, vector<16x16xf32>, vector<16x16xf32>, vector<16x16xf32>, vector<16x16xf32>, vector<16x16xf32>, vector<16x16xf32> -> vector<16x128xf32>
    %196 = arith.addf %96, %195 : vector<16x128xf32>
    %c0_109 = arith.constant 0 : index
    %c0_110 = arith.constant 0 : index
    %197 = vector.load %arg26[%c0_109, %c0_110] : memref<16x128xf32, #tpu.memory_space<vmem>>, vector<16x128xf32>
    tpu.vector_store %arg26[%c0_109, %c0_110], %196 {strides = array<i32>} : memref<16x128xf32, #tpu.memory_space<vmem>>, vector<16x128xf32>,
    %c2_i32 = arith.constant 2 : i32
    %198 = arith.cmpi eq, %arg1, %c2_i32 : i32
    %199 = arith.extui %198 : i1 to i32
    %c0_i32_111 = arith.constant 0 : i32
    %200 = arith.cmpi ne, %199, %c0_i32_111 : i32
    scf.if %200 {
      %c0_112 = arith.constant 0 : index
      %c0_113 = arith.constant 0 : index
      %201 = vector.load %arg25[%c0_112, %c0_113] : memref<16x128xf32, #tpu.memory_space<vmem>>, vector<16x128xf32>
      tpu.vector_store %arg25[%c0_112, %c0_113], %196 {strides = array<i32>} : memref<16x128xf32, #tpu.memory_space<vmem>>, vector<16x128xf32>,
    } else {
    }
    return
  }
  func.func @transform_0(%arg0: i32, %arg1: i32) -> (i32, i32) {
    %c0_i32 = arith.constant 0 : i32
    %c0_i32_0 = arith.constant 0 : i32
    return %arg0, %c0_i32 : i32, i32
  }
  func.func @transform_1(%arg0: i32, %arg1: i32) -> (i32, i32) {
    %c0_i32 = arith.constant 0 : i32
    %c0_i32_0 = arith.constant 0 : i32
    %c0_i32_1 = arith.constant 0 : i32
    return %c0_i32, %c0_i32_0 : i32, i32
  }
  func.func @transform_2(%arg0: i32, %arg1: i32) -> (i32, i32) {
    %c0_i32 = arith.constant 0 : i32
    %c0_i32_0 = arith.constant 0 : i32
    %c0_i32_1 = arith.constant 0 : i32
    return %c0_i32, %c0_i32_0 : i32, i32
  }
  func.func @transform_3(%arg0: i32, %arg1: i32) -> (i32, i32, i32) {
    %c0_i32 = arith.constant 0 : i32
    %c0_i32_0 = arith.constant 0 : i32
    %c0_i32_1 = arith.constant 0 : i32
    return %arg1, %c0_i32, %c0_i32_0 : i32, i32, i32
  }
  func.func @transform_4(%arg0: i32, %arg1: i32) -> (i32, i32, i32) {
    %c0_i32 = arith.constant 0 : i32
    %c0_i32_0 = arith.constant 0 : i32
    %c0_i32_1 = arith.constant 0 : i32
    return %arg1, %c0_i32, %c0_i32_0 : i32, i32, i32
  }
  func.func @transform_5(%arg0: i32, %arg1: i32) -> (i32, i32, i32) {
    %c0_i32 = arith.constant 0 : i32
    %c0_i32_0 = arith.constant 0 : i32
    %c0_i32_1 = arith.constant 0 : i32
    return %arg1, %c0_i32, %c0_i32_0 : i32, i32, i32
  }
  func.func @transform_6(%arg0: i32, %arg1: i32) -> (i32, i32, i32) {
    %c0_i32 = arith.constant 0 : i32
    %c0_i32_0 = arith.constant 0 : i32
    %c0_i32_1 = arith.constant 0 : i32
    return %arg1, %c0_i32, %c0_i32_0 : i32, i32, i32
  }
  func.func @transform_7(%arg0: i32, %arg1: i32) -> (i32, i32, i32) {
    %c0_i32 = arith.constant 0 : i32
    %c0_i32_0 = arith.constant 0 : i32
    %c0_i32_1 = arith.constant 0 : i32
    return %arg1, %c0_i32, %c0_i32_0 : i32, i32, i32
  }
  func.func @transform_8(%arg0: i32, %arg1: i32) -> (i32, i32, i32) {
    %c0_i32 = arith.constant 0 : i32
    %c0_i32_0 = arith.constant 0 : i32
    %c0_i32_1 = arith.constant 0 : i32
    return %arg1, %c0_i32, %c0_i32_0 : i32, i32, i32
  }
  func.func @transform_9(%arg0: i32, %arg1: i32) -> (i32, i32, i32) {
    %c0_i32 = arith.constant 0 : i32
    %c0_i32_0 = arith.constant 0 : i32
    %c0_i32_1 = arith.constant 0 : i32
    return %arg1, %c0_i32, %c0_i32_0 : i32, i32, i32
  }
  func.func @transform_10(%arg0: i32, %arg1: i32) -> (i32, i32, i32) {
    %c0_i32 = arith.constant 0 : i32
    %c0_i32_0 = arith.constant 0 : i32
    %c0_i32_1 = arith.constant 0 : i32
    return %arg1, %c0_i32, %c0_i32_0 : i32, i32, i32
  }
  func.func @transform_11(%arg0: i32, %arg1: i32) -> (i32, i32, i32) {
    %c0_i32 = arith.constant 0 : i32
    %c0_i32_0 = arith.constant 0 : i32
    %c0_i32_1 = arith.constant 0 : i32
    return %arg1, %c0_i32, %c0_i32_0 : i32, i32, i32
  }
  func.func @transform_12(%arg0: i32, %arg1: i32) -> (i32, i32, i32) {
    %c0_i32 = arith.constant 0 : i32
    %c0_i32_0 = arith.constant 0 : i32
    %c0_i32_1 = arith.constant 0 : i32
    return %arg1, %c0_i32, %c0_i32_0 : i32, i32, i32
  }
  func.func @transform_13(%arg0: i32, %arg1: i32) -> (i32, i32, i32) {
    %c0_i32 = arith.constant 0 : i32
    %c0_i32_0 = arith.constant 0 : i32
    %c0_i32_1 = arith.constant 0 : i32
    return %arg1, %c0_i32, %c0_i32_0 : i32, i32, i32
  }
  func.func @transform_14(%arg0: i32, %arg1: i32) -> (i32, i32, i32) {
    %c0_i32 = arith.constant 0 : i32
    %c0_i32_0 = arith.constant 0 : i32
    %c0_i32_1 = arith.constant 0 : i32
    return %arg1, %c0_i32, %c0_i32_0 : i32, i32, i32
  }
  func.func @transform_15(%arg0: i32, %arg1: i32) -> (i32, i32, i32) {
    %c0_i32 = arith.constant 0 : i32
    %c0_i32_0 = arith.constant 0 : i32
    %c0_i32_1 = arith.constant 0 : i32
    return %arg1, %c0_i32, %c0_i32_0 : i32, i32, i32
  }
  func.func @transform_16(%arg0: i32, %arg1: i32) -> (i32, i32, i32) {
    %c0_i32 = arith.constant 0 : i32
    %c0_i32_0 = arith.constant 0 : i32
    %c0_i32_1 = arith.constant 0 : i32
    return %arg1, %c0_i32, %c0_i32_0 : i32, i32, i32
  }
  func.func @transform_17(%arg0: i32, %arg1: i32) -> (i32, i32, i32) {
    %c0_i32 = arith.constant 0 : i32
    %c0_i32_0 = arith.constant 0 : i32
    %c0_i32_1 = arith.constant 0 : i32
    return %arg1, %c0_i32, %c0_i32_0 : i32, i32, i32
  }
  func.func @transform_18(%arg0: i32, %arg1: i32) -> (i32, i32, i32) {
    %c0_i32 = arith.constant 0 : i32
    %c0_i32_0 = arith.constant 0 : i32
    %c0_i32_1 = arith.constant 0 : i32
    return %arg1, %c0_i32, %c0_i32_0 : i32, i32, i32
  }
  func.func @transform_19(%arg0: i32, %arg1: i32) -> (i32, i32) {
    %c0_i32 = arith.constant 0 : i32
    %c0_i32_0 = arith.constant 0 : i32
    %c0_i32_1 = arith.constant 0 : i32
    return %c0_i32, %c0_i32_0 : i32, i32
  }
  func.func @transform_20(%arg0: i32, %arg1: i32) -> (i32, i32) {
    %c0_i32 = arith.constant 0 : i32
    %c0_i32_0 = arith.constant 0 : i32
    %c0_i32_1 = arith.constant 0 : i32
    return %c0_i32, %c0_i32_0 : i32, i32
  }
  func.func @transform_21(%arg0: i32, %arg1: i32) -> (i32, i32) {
    %c0_i32 = arith.constant 0 : i32
    %c0_i32_0 = arith.constant 0 : i32
    %c0_i32_1 = arith.constant 0 : i32
    return %c0_i32, %c0_i32_0 : i32, i32
  }
  func.func @transform_22(%arg0: i32, %arg1: i32) -> (i32, i32) {
    %c0_i32 = arith.constant 0 : i32
    %c0_i32_0 = arith.constant 0 : i32
    %c0_i32_1 = arith.constant 0 : i32
    return %c0_i32, %c0_i32_0 : i32, i32
  }
  func.func @transform_23(%arg0: i32, %arg1: i32) -> (i32, i32) {
    %c0_i32 = arith.constant 0 : i32
    %c0_i32_0 = arith.constant 0 : i32
    return %arg0, %c0_i32 : i32, i32
  }
}

</mosaic_0001>

<bundles_post_ra>
// kernel: seq_transformer_ca_forward.1
= control target key start
LH: loop header
LB: loop body
LE: loop exit
PB: predicated region body
PF: predicated region fallthrough
CT: control target
= control target key end

     0   :  { %s5955_s30 = smov 0   ;;  %s5957_s24 = smov 0   ;;  %s6853_s0 = inlined_call_operand.vmem [shape: f32[32,64], index: 0, kind: input, shape index: {}]   ;;  %s6854_s1 = inlined_call_operand.vmem [shape: f32[8,16], index: 1, kind: input, shape index: {}]   ;;  %s6855_s2 = inlined_call_operand.vmem [shape: f32[1,16], index: 2, kind: input, shape index: {}]   ;;  %s6856_s3 = inlined_call_operand.vmem [shape: f32[3,1,128], index: 3, kind: input, shape index: {}]   ;;  %s6857_s4 = inlined_call_operand.vmem [shape: f32[3,1,128], index: 4, kind: input, shape index: {}]   ;;  %s6858_s5 = inlined_call_operand.vmem [shape: f32[3,8,16], index: 5, kind: input, shape index: {}]   ;;  %s6859_s6 = inlined_call_operand.vmem [shape: f32[3,8,1], index: 6, kind: input, shape index: {}]   ;;  %s6860_s7 = inlined_call_operand.vmem [shape: f32[3,8,1], index: 7, kind: input, shape index: {}]   ;;  %s6861_s8 = inlined_call_operand.vmem [shape: f32[3,8,1], index: 8, kind: input, shape index: {}]   ;;  %s6862_s9 = inlined_call_operand.vmem [shape: f32[3,16,8], index: 9, kind: input, shape index: {}]   ;;  %s6863_s10 = inlined_call_operand.vmem [shape: f32[3,16,1], index: 10, kind: input, shape index: {}]   ;;  %s6864_s11 = inlined_call_operand.vmem [shape: f32[3,16,8], index: 11, kind: input, shape index: {}]   ;;  %s6865_s12 = inlined_call_operand.vmem [shape: f32[3,16,1], index: 12, kind: input, shape index: {}]   ;;  %s6866_s13 = inlined_call_operand.vmem [shape: f32[3,1,128], index: 13, kind: input, shape index: {}]   ;;  %s6867_s14 = inlined_call_operand.vmem [shape: f32[3,1,128], index: 14, kind: input, shape index: {}]   ;;  %s6868_s15 = inlined_call_operand.vmem [shape: f32[3,16,32], index: 15, kind: input, shape index: {}]   ;;  %s6869_s16 = inlined_call_operand.vmem [shape: f32[3,1,32], index: 16, kind: input, shape index: {}]   ;;  %s6870_s17 = inlined_call_operand.vmem [shape: f32[3,32,16], index: 17, kind: input, shape index: {}]   ;;  %s6871_s18 = inlined_call_operand.vmem [shape: f32[3,1,16], index: 18, kind: input, shape index: {}]   ;;  %s6872_s19 = inlined_call_operand.vmem [shape: f32[128,8], index: 19, kind: input, shape index: {}]   ;;  %s6873_s20 = inlined_call_operand.vmem [shape: f32[8,128], index: 20, kind: input, shape index: {}]   ;;  %s6874_s21 = inlined_call_operand.vmem [shape: f32[128,16], index: 21, kind: input, shape index: {}]   ;;  %s6875_s22 = inlined_call_operand.vmem [shape: f32[16,128], index: 22, kind: input, shape index: {}]   ;;  %s6876_s23 = inlined_call_operand.vmem [shape: f32[32,128], index: 23, kind: output, shape index: {}]  }
   0x1   :  { %6882 = sst [smem:[#allocation9_spill]] %s6853_s0  ;;  %s5959_s25 = smov 0  }
   0x2   :  { %6883 = sst [smem:[#allocation10_spill]] %s6854_s1 }
   0x3   :  { %6884 = sst [smem:[#allocation11_spill]] %s6855_s2 }
   0x4   :  { %6885 = sst [smem:[#allocation12_spill]] %s6856_s3 }
   0x5   :  { %6886 = sst [smem:[#allocation13_spill]] %s6857_s4  ;;  %s5953_s4 = smov 0  }
   0x6   :  { %6887 = sst [smem:[#allocation14_spill]] %s6858_s5  ;;  %s5961_s5 = smov 0  }
   0x7   :  { %6888 = sst [smem:[#allocation15_spill]] %s6859_s6 }
   0x8   :  { %6889 = sst [smem:[#allocation16_spill]] %s6860_s7 }
   0x9   :  { %6890 = sst [smem:[#allocation17_spill]] %s6862_s9 }
   0xa   :  { %6891 = sst [smem:[#allocation18_spill]] %s6863_s10 }
   0xb   :  { %6892 = sst [smem:[#allocation19_spill]] %s6864_s11 }
   0xc   :  { %6893 = sst [smem:[#allocation20_spill]] %s6865_s12 }
   0xd   :  { %6894 = sst [smem:[#allocation21_spill]] %s6867_s14 }
   0xe   :  { %6895 = sst [smem:[#allocation22_spill]] %s6870_s17 }
   0xf   :  { %6896 = sst [smem:[#allocation23_spill]] %s6872_s19 }
  0x10   :  { %6897 = sst [smem:[#allocation24_spill]] %s6873_s20 }
  0x11   :  { %6898 = sst [smem:[#allocation25_spill]] %s6874_s21 }
  0x12   :  { %6899 = sst [smem:[#allocation26_spill]] %s6875_s22 }
  0x13   :  { %6900 = sst [smem:[#allocation27_spill]] %s6876_s23 }
  0x14 LB: > { %6901 = sst [smem:[#allocation3_spill]] %s5794_s4  ;;  %s42_s1 = sadd.s32 1, %s5802_s24  ;;  %s5810_s5 = sphi %s5961_s5, %s33_s5   ;;  %s5806_s25 = sphi %s5959_s25, %s6947_s25   ;;  %s5802_s24 = sphi %s5957_s24, %s6946_s24   ;;  %s5798_s30 = sphi %s5955_s30, %s6945_s30   ;;  %s5794_s4 = sphi %s5953_s4, %s6944_s4  }
  0x15   : > { %6902 = sst [smem:[#allocation4_spill]] %s5802_s24  ;;  %s45_s26 = sadd.s32 1, %s5806_s25 }
  0x16   : > { %6903 = sst [smem:[#allocation5_spill]] %s5806_s25  ;;  %p43_p0 = scmp.ge.s32.totalorder %s42_s1, 3 }
  0x17   : > { %6904 = sst [smem:[#allocation6_spill]] %s5810_s5  ;;  %p4884_p1 = scmp.ge.s32.totalorder %s5810_s5, 1 }
  0x18   : > { %p794_p2 = scmp.lt.s32.totalorder %s5810_s5, 7  ;;  %s6949_s1 = smov (%p43_p0, %s42_s1), 0 }
  0x19   : > { %6905 = sst [smem:[#allocation7_spill]] %s6949_s1  ;;  %s6951_s26 = smov (!%p43_p0, %s45_s26), %s5806_s25 }
  0x1a   : > { %p795_p3 = pnand %p4884_p1, %p794_p2  ;;  %p47_p4 = scmp.ge.s32.totalorder %s6951_s26, 2 }
  0x1b   : > { %s4885_s2 = sshll.u32 (!%p795_p3), %s5798_s30, 1  ;;  %p928_p5 = scmp.lt.s32.totalorder (!%p795_p3), %s5794_s4, 2 }
  0x1c   : > { %s6953_s26 = smov (%p47_p4, %s6951_s26), 0  ;;  %798 = sbr.rel (%p795_p3) target bundleno = 4252 (0x109c), region = 112 }
  0x1d   : > { %6906 = sst [smem:[#allocation8_spill]] %s6953_s26  ;;  %p923_p6 = scmp.lt.s32.totalorder (!%p795_p3), %s4885_s2, 3 }
  0x1e   : > { %s6907_s19 = sld [smem:[#allocation23_spill]] (!%p795_p3) }
  0x1f   : > { %s6910_s20 = sld [smem:[#allocation24_spill]] (!%p795_p3) }
  0x20   : > { %s6911_s21 = sld [smem:[#allocation25_spill]] (!%p795_p3) }
  0x21   : > { %s6017_s28 = scalar_select %p928_p5, %s5794_s4, 2 }
  0x22   : > { %s6955_s2 = smov (!%p923_p6, %s4885_s2), 3  ;;  %s6912_s0 = sld [smem:[#allocation9_spill]] }
  0x23   : > { %s6881_s1 = sshll.u32 %s6955_s2, 3  ;;  %s6076_s26 = sshll.u32 %s6017_s28, 3 }
  0x24   : > { %v5989_v0 = vld [vmem:[%s6907_s19] sm:$0xff]  ;;  %v5994_v1 = vld [vmem:[%s6907_s19 + $0x8] sm:$0xff]  ;;  %v5999_v2 = vld [vmem:[%s6907_s19 + $0x10] sm:$0xff]  ;;  %s6916_s9 = sld [smem:[#allocation17_spill]]  ;;  %s6923_s27 = sshll.u32 %s6955_s2, 3 }
  0x25   : > { %v6004_v3 = vld [vmem:[%s6907_s19 + $0x18] sm:$0xff]  ;;  %v6009_v4 = vld [vmem:[%s6907_s19 + $0x20] sm:$0xff]  ;;  %v6014_v5 = vld [vmem:[%s6907_s19 + $0x28] sm:$0xff]  ;;  %s6917_s10 = sld [smem:[#allocation18_spill]] }
  0x26   : > { %v6022_v6 = vld [vmem:[%s6907_s19 + $0x30] sm:$0xff]  ;;  %v6027_v7 = vld [vmem:[%s6907_s19 + $0x38] sm:$0xff]  ;;  %v6032_v8 = vld [vmem:[%s6907_s19 + $0x40] sm:$0xff]  ;;  %s6918_s11 = sld [smem:[#allocation19_spill]] }
  0x27   : > { %v6039_v9 = vld [vmem:[%s6907_s19 + $0x48] sm:$0xff]  ;;  %v6044_v10 = vld [vmem:[%s6907_s19 + $0x50] sm:$0xff]  ;;  %v6049_v11 = vld [vmem:[%s6907_s19 + $0x58] sm:$0xff]  ;;  %s6919_s12 = sld [smem:[#allocation20_spill]] }
  0x28   : > { %v6062_v12 = vld [vmem:[%s6907_s19 + $0x60] sm:$0xff]  ;;  %v6067_v13 = vld [vmem:[%s6907_s19 + $0x68] sm:$0xff]  ;;  %v6072_v14 = vld [vmem:[%s6907_s19 + $0x70] sm:$0xff]  ;;  %s6098_s30 = scalar_lea.vmem %s6912_s0, %s6881_s1  ;;  %s4986_s0 = sshll.u32 %s6017_s28, 4 }
  0x29   : > { %v6081_v15 = vld [vmem:[%s6907_s19 + $0x78] sm:$0xff]  ;;  %v6086_v16 = vld [vmem:[%s6910_s20] sm:$0xff]  ;;  %v6107_v18 = vld [vmem:[%s6911_s21 + $0x8] sm:$0xff]  ;;  %s6921_s22 = sld [smem:[#allocation26_spill]]  ;;  %s4991_s19 = sshll.u32 %s6017_s28, 5 }
  0x2a   : > { %v6091_v17 = vld [vmem:[%s6911_s21] sm:$0xff]  ;;  %v6112_v19 = vld [vmem:[%s6911_s21 + $0x10] sm:$0xff]  ;;  %v6117_v20 = vld [vmem:[%s6911_s21 + $0x18] sm:$0xff]  ;;  %s6165_s29 = scalar_lea.vmem %s6916_s9, %s4986_s0  ;;  %s6924_s9 = sld [smem:[#allocation27_spill]] }
  0x2b   : > { %v6130_v21 = vld [vmem:[%s6911_s21 + $0x20] sm:$0xff]  ;;  %v6135_v22 = vld [vmem:[%s6911_s21 + $0x28] sm:$0xff]  ;;  %v6140_v23 = vld [vmem:[%s6911_s21 + $0x30] sm:$0xff]  ;;  %s6170_s5 = scalar_lea.vmem %s6917_s10, %s4986_s0  ;;  %s983_s10 = scalar_lea.vmem %s6869_s16, %s6017_s28 }
  0x2c   : > { %v6150_v24 = vld [vmem:[%s6911_s21 + $0x38] sm:$0xff]  ;;  %v6155_v25 = vld [vmem:[%s6911_s21 + $0x40] sm:$0xff]  ;;  %v6160_v26 = vld [vmem:[%s6911_s21 + $0x48] sm:$0xff]  ;;  %s6190_s17 = scalar_lea.vmem %s6918_s11, %s4986_s0  ;;  %s991_s11 = scalar_lea.vmem %s6871_s18, %s6017_s28 }
  0x2d   : > { %v6175_v27 = vld [vmem:[%s6911_s21 + $0x50] sm:$0xff]  ;;  %v6180_v28 = vld [vmem:[%s6911_s21 + $0x58] sm:$0xff]  ;;  %v6185_v29 = vld [vmem:[%s6911_s21 + $0x60] sm:$0xff]  ;;  %s6195_s25 = scalar_lea.vmem %s6919_s12, %s4986_s0  ;;  %s6233_s12 = scalar_lea.vmem %s6868_s15, %s4986_s0 }
  0x2e   : > { %v6200_v30 = vld [vmem:[%s6911_s21 + $0x68] sm:$0xff]  ;;  %v6205_v31 = vld [vmem:[%s6911_s21 + $0x70] sm:$0xff]  ;;  %v6210_v32 = vld [vmem:[%s6911_s21 + $0x78] sm:$0xff]  ;;  %s6922_s21 = sld [smem:[#allocation22_spill]] }
  0x2f   : > { %v6223_v33 = vld [vmem:[%s6921_s22] sm:$0xff]  ;;  %v6228_v34 = vld [vmem:[%s6921_s22 + $0x8] sm:$0xff]  ;;  %s6925_s7 = sld [smem:[#allocation3_spill]] }
  0x30   : > { %s6254_s0 = scalar_lea.vmem %s6924_s9, %s6923_s27 }
  0x34   : > { %s6247_s4 = scalar_lea.vmem %s6922_s21, %s4991_s19 }
  0x35   : > { %p4905_p7 = scmp.ne.s32.totalorder %s6925_s7, 0 }
  0x36   : > { %s6926_s24 = sld [smem:[#allocation10_spill]] (!%p4905_p7)  ;;  %s5812_s20 = smov (!%p4905_p7), 120  }
  0x37   : > { %1036 = sbr.rel (%p4905_p7) target bundleno = 517 (0x205), region = 116  ;;  %s5813_s21 = smov (!%p4905_p7), 112  }
  0x38   : > { %s5814_s14 = smov (!%p4905_p7), 104   ;;  %s5815_s22 = smov (!%p4905_p7), 96  }
  0x39   : > { %s5816_s2 = smov (!%p4905_p7), 88   ;;  %s5818_s1 = smov (!%p4905_p7), 72  }
  0x3a   : > { %s6927_s27 = sld [smem:[#allocation11_spill]] (!%p4905_p7)  ;;  %s5819_s9 = smov (!%p4905_p7), 16  }
  0x3b   : > { %s5820_s7 = smov (!%p4905_p7), 32   ;;  %s5821_s3 = smov (!%p4905_p7), 48  }
  0x3c   : > { %v1132_v35 = vld [vmem:[%s6098_s30] sm:$0xff]  ;;  %vm1047_vm0 = vcmask 64512   ;;  %v1133_v37 = vld [vmem:[%s6098_s30 + $0x8] sm:$0xff]  ;;  %s5817_s30 = smov 80   ;;  %vm1129_vm1 = vcmask 130048   ;;  %s5822_s6 = smov 64  }
  0x3d   : > { %v1037_v36 = vld [vmem:[%s6926_s24] sm:$0xff]  ;;  %1136 = vrot.lane.b32.xlu0 %v1132_v35, %s5812_s20  ;;  %1234 = vrot.lane.b32.xlu1 %v1132_v35, %s5813_s21  ;;  %vm1227_vm2 = vcmask 261248   ;;  %vm1325_vm3 = vcmask 392448   ;;  %vm1423_vm4 = vcmask 523648   ;;  %vm1521_vm5 = vcmask 654848  }
  0x3e   : > { %5235 = vmatprep.subr.mxu0 %v1037_v36  ;;  %5237 = vmatprep.mubr.msk.f32.mxu0 %vm1047_vm0, %v1132_v35  ;;  %vm1619_vm6 = vcmask 786048   ;;  %vm1717_vm7 = vcmask 917248   ;;  %vm1815_vm8 = vcmask 1048448  }
  0x3f   : > { %5236 = vmatpush3.msra.mxu0 %v1037_v36  ;;  %5240 = vmatprep.subr.mxu1 %v1037_v36 }
  0x40   : > { %5238 = vmatmul.mubr.msk.f32.vlgmr.msra.gmra.mxu0 %vm1047_vm0, %v1133_v37  ;;  %5241 = vmatpush3.msra.mxu1 %v1037_v36  ;;  %v4906_v52 = vld [vmem:[%s6927_s27] ss:$0 sm:$0xff] }
  0x41   : > { %1138 = vrot.lane.b32.xlu0 %v1133_v37, %s5812_s20  ;;  %1236 = vrot.lane.b32.xlu1 %v1133_v37, %s5813_s21 }
  0x42   : > { %5245 = vmatprep.subr.mxu0 %v1037_v36  ;;  %5250 = vmatprep.subr.mxu1 %v1037_v36 }
  0x43   : > { %5246 = vmatpush3.msra.mxu0 %v1037_v36 }
  0x44   : > { %5255 = vmatprep.subr.mxu0 %v1037_v36 }
  0x45   : > { %1332 = vrot.lane.b32.xlu0 %v1132_v35, %s5814_s14  ;;  %1334 = vrot.lane.b32.xlu1 %v1133_v37, %s5814_s14 }
  0x49   : > { %1430 = vrot.lane.b32.xlu0 %v1132_v35, %s5815_s22  ;;  %1432 = vrot.lane.b32.xlu1 %v1133_v37, %s5815_s22 }
  0x4d   : > { %1528 = vrot.lane.b32.xlu0 %v1132_v35, %s5816_s2  ;;  %1530 = vrot.lane.b32.xlu1 %v1133_v37, %s5816_s2 }
  0x51   : > { %1626 = vrot.lane.b32.xlu0 %v1132_v35, %s5817_s30  ;;  %1628 = vrot.lane.b32.xlu1 %v1133_v37, %s5817_s30 }
  0x55   : > { %1724 = vrot.lane.b32.xlu0 %v1132_v35, %s5818_s1  ;;  %1726 = vrot.lane.b32.xlu1 %v1133_v37, %s5818_s1 }
  0xaf   : > { %v1137_v38 = vpop.permute.xlu0 %1136  ;;  %v1235_v39 = vpop.permute.xlu1 %1234 }
  0xb0   : > { %5242 = vmatprep.mubr.msk.f32.mxu1 %vm1047_vm0, %v1137_v38  ;;  %5247 = vmatprep.mubr.msk.f32.mxu0 %vm1047_vm0, %v1235_v39 }
  0xb3   : > { %v1139_v40 = vpop.permute.xlu0 %1138  ;;  %v1237_v41 = vpop.permute.xlu1 %1236 }
  0xb4   : > { %5243 = vmatmul.mubr.msk.f32.vlgmr.msra.gmra.mxu1 %vm1047_vm0, %v1139_v40  ;;  %5248 = vmatmul.mubr.msk.f32.vlgmr.msra.gmra.mxu0 %vm1047_vm0, %v1237_v41 }
  0xb5   : > { %5251 = vmatpush3.msra.mxu1 %v1037_v36  ;;  %5256 = vmatpush3.msra.mxu0 %v1037_v36 }
  0xb6   : > { %5260 = vmatprep.subr.mxu1 %v1037_v36  ;;  %5265 = vmatprep.subr.mxu0 %v1037_v36 }
  0xb7   : > { %v1333_v42 = vpop.permute.xlu0 %1332  ;;  %v1335_v43 = vpop.permute.xlu1 %1334 }
  0xb8   : > { %5252 = vmatprep.mubr.msk.f32.mxu1 %vm1047_vm0, %v1333_v42 }
  0xb9   : > { %5253 = vmatmul.mubr.msk.f32.vlgmr.msra.gmra.mxu1 %vm1047_vm0, %v1335_v43 }
  0xba   : > { %5261 = vmatpush3.msra.mxu1 %v1037_v36 }
  0xbb   : > { %v1431_v44 = vpop.permute.xlu0 %1430  ;;  %v1433_v45 = vpop.permute.xlu1 %1432  ;;  %5270 = vmatprep.subr.mxu1 %v1037_v36 }
  0xbc   : > { %5257 = vmatprep.mubr.msk.f32.mxu0 %vm1047_vm0, %v1431_v44 }
  0xbd   : > { %5258 = vmatmul.mubr.msk.f32.vlgmr.msra.gmra.mxu0 %vm1047_vm0, %v1433_v45 }
  0xbe   : > { %5266 = vmatpush3.msra.mxu0 %v1037_v36 }
  0xbf   : > { %v1529_v46 = vpop.permute.xlu0 %1528  ;;  %v1531_v47 = vpop.permute.xlu1 %1530 }
  0xc0   : > { %5262 = vmatprep.mubr.msk.f32.mxu1 %vm1047_vm0, %v1529_v46 }
  0xc1   : > { %5263 = vmatmul.mubr.msk.f32.vlgmr.msra.gmra.mxu1 %vm1047_vm0, %v1531_v47 }
  0xc2   : > { %5271 = vmatpush3.msra.mxu1 %v1037_v36 }
  0xc3   : > { %v1627_v48 = vpop.permute.xlu0 %1626  ;;  %v1629_v49 = vpop.permute.xlu1 %1628 }
  0xc4   : > { %5267 = vmatprep.mubr.msk.f32.mxu0 %vm1047_vm0, %v1627_v48 }
  0xc5   : > { %5268 = vmatmul.mubr.msk.f32.vlgmr.msra.gmra.mxu0 %vm1047_vm0, %v1629_v49 }
  0xc7   : > { %v1725_v50 = vpop.permute.xlu0 %1724  ;;  %v1727_v51 = vpop.permute.xlu1 %1726 }
  0xc8   : > { %5272 = vmatprep.mubr.msk.f32.mxu1 %vm1047_vm0, %v1725_v50 }
  0xc9   : > { %5273 = vmatmul.mubr.msk.f32.vlgmr.msra.gmra.mxu1 %vm1047_vm0, %v1727_v51 }
 0x100   : > { %v5239_v53 = vpop.f32.mrf.mxu0 }
 0x101   : > { %v1126_v54 = vadd.f32 %v5239_v53, %v4906_v52 }
 0x102   : > { %v1120_v55 = vpop.f32.mrf.mxu0 }
 0x103   : > { %1131 = vst.msk [vmem:[#allocation2 + $0x8] sm:$0xff] %vm1129_vm1, %v1126_v54  ;;  %v1121_v56 = vadd.f32 %v4906_v52, %v1120_v55 }
 0x105   : > { %1130 = vst.msk [vmem:[#allocation2] sm:$0xff] %vm1129_vm1, %v1121_v56 }
 0x174   : > { %v5244_v57 = vpop.f32.mrf.mxu1  ;;  %v5249_v58 = vpop.f32.mrf.mxu0 }
 0x175   : > { %v1216_v59 = vadd.f32 %v5244_v57, %v4906_v52  ;;  %v1314_v62 = vadd.f32 %v5249_v58, %v4906_v52 }
 0x176   : > { %v1210_v60 = vpop.f32.mrf.mxu1  ;;  %v1308_v63 = vpop.f32.mrf.mxu0 }
 0x177   : > { %v1211_v61 = vadd.f32 %v4906_v52, %v1210_v60  ;;  %1223 = vrot.lane.b32.xlu1 %v1216_v59, %s5819_s9  ;;  %v1309_v36 = vadd.f32 %v4906_v52, %v1308_v63 }
 0x179   : > { %1221 = vrot.lane.b32.xlu0 %v1211_v61, %s5819_s9  ;;  %v5254_v35 = vpop.f32.mrf.mxu1 }
 0x17a   : > { %v1412_v37 = vadd.f32 %v5254_v35, %v4906_v52 }
 0x17b   : > { %1321 = vrot.lane.b32.xlu1 %v1314_v62, %s5820_s7  ;;  %v1406_v38 = vpop.f32.mrf.mxu1 }
 0x17c   : > { %v1407_v40 = vadd.f32 %v4906_v52, %v1406_v38 }
 0x17d   : > { %1319 = vrot.lane.b32.xlu0 %v1309_v36, %s5820_s7  ;;  %v5259_v39 = vpop.f32.mrf.mxu0 }
 0x17e   : > { %v1510_v41 = vadd.f32 %v5259_v39, %v4906_v52 }
 0x17f   : > { %1419 = vrot.lane.b32.xlu1 %v1412_v37, %s5821_s3  ;;  %v1504_v42 = vpop.f32.mrf.mxu0 }
 0x180   : > { %v1505_v44 = vadd.f32 %v4906_v52, %v1504_v42 }
 0x181   : > { %1417 = vrot.lane.b32.xlu0 %v1407_v40, %s5821_s3  ;;  %v5264_v43 = vpop.f32.mrf.mxu1 }
 0x182   : > { %v1608_v45 = vadd.f32 %v5264_v43, %v4906_v52 }
 0x183   : > { %1517 = vrot.lane.b32.xlu1 %v1510_v41, %s5822_s6  ;;  %v1602_v46 = vpop.f32.mrf.mxu1 }
 0x184   : > { %v1603_v48 = vadd.f32 %v4906_v52, %v1602_v46 }
 0x185   : > { %1515 = vrot.lane.b32.xlu0 %v1505_v44, %s5822_s6  ;;  %v5269_v47 = vpop.f32.mrf.mxu0 }
 0x186   : > { %v1706_v49 = vadd.f32 %v5269_v47, %v4906_v52 }
 0x187   : > { %1615 = vrot.lane.b32.xlu1 %v1608_v45, %s5817_s30  ;;  %v1700_v50 = vpop.f32.mrf.mxu0 }
 0x188   : > { %v1701_v53 = vadd.f32 %v4906_v52, %v1700_v50 }
 0x189   : > { %1613 = vrot.lane.b32.xlu0 %v1603_v48, %s5817_s30  ;;  %v5274_v51 = vpop.f32.mrf.mxu1 }
 0x18a   : > { %v1804_v54 = vadd.f32 %v5274_v51, %v4906_v52 }
 0x18b   : > { %1713 = vrot.lane.b32.xlu1 %v1706_v49, %s5815_s22  ;;  %v1798_v55 = vpop.f32.mrf.mxu1 }
 0x18c   : > { %v1799_v56 = vadd.f32 %v4906_v52, %v1798_v55 }
 0x18d   : > { %1711 = vrot.lane.b32.xlu0 %v1701_v53, %s5815_s22 }
 0x18f   : > { %1811 = vrot.lane.b32.xlu1 %v1804_v54, %s5813_s21 }
 0x191   : > { %1809 = vrot.lane.b32.xlu0 %v1799_v56, %s5813_s21 }
 0x1e9   : > { %v1224_v57 = vpop.permute.xlu1 %1223 }
 0x1ea   : > { %1229 = vst.msk [vmem:[#allocation2 + $0x8] sm:$0xff] %vm1227_vm2, %v1224_v57 }
 0x1eb   : > { %v1222_v58 = vpop.permute.xlu0 %1221 }
 0x1ec   : > { %1228 = vst.msk [vmem:[#allocation2] sm:$0xff] %vm1227_vm2, %v1222_v58 }
 0x1ed   : > { %v1322_v59 = vpop.permute.xlu1 %1321 }
 0x1ee   : > { %1327 = vst.msk [vmem:[#allocation2 + $0x8] sm:$0xff] %vm1325_vm3, %v1322_v59 }
 0x1ef   : > { %v1320_v60 = vpop.permute.xlu0 %1319 }
 0x1f0   : > { %1326 = vst.msk [vmem:[#allocation2] sm:$0xff] %vm1325_vm3, %v1320_v60 }
 0x1f1   : > { %v1420_v61 = vpop.permute.xlu1 %1419 }
 0x1f2   : > { %1425 = vst.msk [vmem:[#allocation2 + $0x8] sm:$0xff] %vm1423_vm4, %v1420_v61 }
 0x1f3   : > { %v1418_v62 = vpop.permute.xlu0 %1417 }
 0x1f4   : > { %1424 = vst.msk [vmem:[#allocation2] sm:$0xff] %vm1423_vm4, %v1418_v62 }
 0x1f5   : > { %v1518_v52 = vpop.permute.xlu1 %1517 }
 0x1f6   : > { %1523 = vst.msk [vmem:[#allocation2 + $0x8] sm:$0xff] %vm1521_vm5, %v1518_v52 }
 0x1f7   : > { %v1516_v63 = vpop.permute.xlu0 %1515 }
 0x1f8   : > { %1522 = vst.msk [vmem:[#allocation2] sm:$0xff] %vm1521_vm5, %v1516_v63 }
 0x1f9   : > { %v1616_v35 = vpop.permute.xlu1 %1615 }
 0x1fa   : > { %1621 = vst.msk [vmem:[#allocation2 + $0x8] sm:$0xff] %vm1619_vm6, %v1616_v35 }
 0x1fb   : > { %v1614_v36 = vpop.permute.xlu0 %1613 }
 0x1fc   : > { %1620 = vst.msk [vmem:[#allocation2] sm:$0xff] %vm1619_vm6, %v1614_v36 }
 0x1fd   : > { %v1714_v37 = vpop.permute.xlu1 %1713 }
 0x1fe   : > { %1719 = vst.msk [vmem:[#allocation2 + $0x8] sm:$0xff] %vm1717_vm7, %v1714_v37 }
 0x1ff   : > { %v1712_v38 = vpop.permute.xlu0 %1711 }
 0x200   : > { %1718 = vst.msk [vmem:[#allocation2] sm:$0xff] %vm1717_vm7, %v1712_v38 }
 0x201   : > { %v1812_v39 = vpop.permute.xlu1 %1811 }
 0x202   : > { %1817 = vst.msk [vmem:[#allocation2 + $0x8] sm:$0xff] %vm1815_vm8, %v1812_v39 }
 0x203   : > { %v1810_v40 = vpop.permute.xlu0 %1809 }
 0x204   : > { %1816 = vst.msk [vmem:[#allocation2] sm:$0xff] %vm1815_vm8, %v1810_v40 }
 0x205 PF: > { %5275 = vmatprep.subr.mxu0 %v6081_v15  ;;  %5315 = vmatprep.subr.mxu1 %v6081_v15  ;;  %vm1897_vm9 = vcmask 64512   ;;  %s6928_s21 = sld [smem:[#allocation12_spill]]  ;;  %vm5824_vm10 = vmmov 0   ;;  %v5825_v54 = vmov 0   ;;  %s6934_s6 = scalar_lea.vmem %s6861_s8, %s6076_s26  ;;  %v2315_v57 = vld [vmem:[%s6170_s5] sm:$0xff]  ;;  %v2316_v58 = vld [vmem:[%s6170_s5 + $0x8] sm:$0xff] }
 0x206   : > { %5276 = vmatpush3.msra.mxu0 %v6081_v15  ;;  %5316 = vmatpush3.msra.mxu1 %v6081_v15  ;;  %s6930_s30 = sld [smem:[#allocation13_spill]]  ;;  %v2312_v55 = vld [vmem:[%s6934_s6] sm:$0xff]  ;;  %v2320_v60 = vld [vmem:[%s6195_s25 + $0x8] sm:$0xff]  ;;  %vm2326_vm11 = vcmask 130048   ;;  %s5826_s23 = smov 112   ;;  %vm3309_vm12 = vcmask 261120  }
 0x207   : > { %5277 = vmatprep.subr.mxu0 %v6072_v14  ;;  %5317 = vmatprep.subr.mxu1 %v6072_v14  ;;  %s6932_s27 = sld [smem:[#allocation15_spill]]  ;;  %v2319_v59 = vld [vmem:[%s6195_s25] sm:$0xff]  ;;  %s5829_s7 = smov 64   ;;  %vm4613_vm13 = vcmask 392192   ;;  %vm4616_vm14 = vcmask 523264   ;;  %vm4619_vm15 = vcmask 654336  }
 0x208   : > { %5278 = vmatpush3.msra.mxu0 %v6072_v14  ;;  %5318 = vmatpush3.msra.mxu1 %v6072_v14  ;;  %v2313_v36 = vld [vmem:[%s6165_s29] sm:$0xff]  ;;  %s6940_s5 = sld [smem:[#allocation21_spill]]  ;;  %s5830_s3 = smov 48   ;;  %vm4622_vm0 = vcmask 785408   ;;  %vm4625_vm1 = vcmask 916480  }
 0x209   : > { %5279 = vmatprep.subr.mxu0 %v6067_v13  ;;  %5319 = vmatprep.subr.mxu1 %v6067_v13  ;;  %v6354_v42 = vld [vmem:[#allocation2 + $0x8] sm:$0xff]  ;;  %v2317_v37 = vld [vmem:[%s6190_s17] sm:$0xff]  ;;  %s5831_s6 = smov 32   ;;  %s5832_s24 = smov 16  }
 0x20a   : > { %5280 = vmatpush3.msra.mxu0 %v6067_v13  ;;  %5320 = vmatpush3.msra.mxu1 %v6067_v13 }
 0x20b   : > { %v6294_v41 = vld [vmem:[#allocation2] sm:$0xff]  ;;  %5281 = vmatprep.subr.mxu0 %v6062_v12  ;;  %5321 = vmatprep.subr.mxu1 %v6062_v12  ;;  %s6929_s14 = scalar_lea.vmem %s6928_s21, %s6017_s28  ;;  %s6935_s21 = sld [smem:[#allocation16_spill]] }
 0x20c   : > { %5307 = vmatprep.mubr.f32.mxu0 %v6294_v41  ;;  %5282 = vmatpush3.msra.mxu0 %v6062_v12  ;;  %s6931_s1 = scalar_lea.vmem %s6930_s30, %s6017_s28  ;;  %s6937_s30 = sld [smem:[#allocation14_spill]] }
 0x20d   : > { %5283 = vmatprep.subr.mxu0 %v6049_v11  ;;  %5322 = vmatpush3.msra.mxu1 %v6062_v12  ;;  %s6933_s9 = scalar_lea.vmem %s6932_s27, %s6076_s26  ;;  %s5827_s27 = smov 96  }
 0x20e   : > { %5284 = vmatpush3.msra.mxu0 %v6049_v11  ;;  %5323 = vmatprep.subr.mxu1 %v6049_v11  ;;  %s6941_s19 = scalar_lea.vmem %s6940_s5, %s6017_s28 }
 0x20f   : > { %5285 = vmatprep.subr.mxu0 %v6044_v10  ;;  %5324 = vmatpush3.msra.mxu1 %v6049_v11 }
 0x210   : > { %5286 = vmatpush3.msra.mxu0 %v6044_v10  ;;  %5325 = vmatprep.subr.mxu1 %v6044_v10 }
 0x211   : > { %5287 = vmatprep.subr.mxu0 %v6039_v9  ;;  %5326 = vmatpush3.msra.mxu1 %v6044_v10 }
 0x212   : > { %5288 = vmatpush3.msra.mxu0 %v6039_v9  ;;  %5327 = vmatprep.subr.mxu1 %v6039_v9 }
 0x213   : > { %5289 = vmatprep.subr.mxu0 %v6032_v8  ;;  %5328 = vmatpush3.msra.mxu1 %v6039_v9 }
 0x214   : > { %5290 = vmatpush3.msra.mxu0 %v6032_v8  ;;  %5329 = vmatprep.subr.mxu1 %v6032_v8 }
 0x215   : > { %5291 = vmatprep.subr.mxu0 %v6027_v7  ;;  %5330 = vmatpush3.msra.mxu1 %v6032_v8 }
 0x216   : > { %5292 = vmatpush3.msra.mxu0 %v6027_v7  ;;  %5331 = vmatprep.subr.mxu1 %v6027_v7 }
 0x217   : > { %5293 = vmatprep.subr.mxu0 %v6022_v6  ;;  %5332 = vmatpush3.msra.mxu1 %v6027_v7 }
 0x218   : > { %5294 = vmatpush3.msra.mxu0 %v6022_v6  ;;  %5333 = vmatprep.subr.mxu1 %v6022_v6 }
 0x219   : > { %5295 = vmatprep.subr.mxu0 %v6014_v5  ;;  %5334 = vmatpush3.msra.mxu1 %v6022_v6 }
 0x21a   : > { %5296 = vmatpush3.msra.mxu0 %v6014_v5  ;;  %5335 = vmatprep.subr.mxu1 %v6014_v5 }
 0x21b   : > { %5297 = vmatprep.subr.mxu0 %v6009_v4  ;;  %5336 = vmatpush3.msra.mxu1 %v6014_v5 }
 0x21c   : > { %5298 = vmatpush3.msra.mxu0 %v6009_v4  ;;  %5337 = vmatprep.subr.mxu1 %v6009_v4 }
 0x21d   : > { %5299 = vmatprep.subr.mxu0 %v6004_v3  ;;  %5338 = vmatpush3.msra.mxu1 %v6009_v4 }
 0x21e   : > { %5300 = vmatpush3.msra.mxu0 %v6004_v3  ;;  %5339 = vmatprep.subr.mxu1 %v6004_v3 }
 0x21f   : > { %5301 = vmatprep.subr.mxu0 %v5999_v2  ;;  %5340 = vmatpush3.msra.mxu1 %v6004_v3 }
 0x220   : > { %5302 = vmatpush3.msra.mxu0 %v5999_v2  ;;  %5341 = vmatprep.subr.mxu1 %v5999_v2 }
 0x221   : > { %5303 = vmatprep.subr.mxu0 %v5994_v1  ;;  %5342 = vmatpush3.msra.mxu1 %v5999_v2 }
 0x222   : > { %5304 = vmatpush3.msra.mxu0 %v5994_v1  ;;  %5343 = vmatprep.subr.mxu1 %v5994_v1 }
 0x223   : > { %5305 = vmatprep.subr.mxu0 %v5989_v0  ;;  %5344 = vmatpush3.msra.mxu1 %v5994_v1 }
 0x224   : > { %5306 = vmatpush3.msra.mxu0 %v5989_v0  ;;  %5345 = vmatprep.subr.mxu1 %v5989_v0 }
 0x225   : > { %5308 = vmatmul.mubr.f32.vlgmr.msra.gmra.mxu0 %v6354_v42  ;;  %5310 = vmatprep.subr.mxu0 %v6086_v16 }
 0x226   : > { %5311 = vmatpush3.msra.mxu0 %v6086_v16  ;;  %5346 = vmatpush3.msra.mxu1 %v5989_v0 }
 0x227   : > { %5350 = vmatprep.subr.mxu0 %v6086_v16  ;;  %5355 = vmatprep.subr.mxu1 %v6081_v15 }
 0x228   : > { %5746 = vset.pattern.permute.xlu0 %v5825_v54  ;;  %5747 = vset.pattern.permute.xlu1 %v5825_v54 }
 0x229   : > { %2408 = vperm.xlu1 %5747, %v2312_v55  }
 0x22d   : > { %2496 = vperm.xlu1 %5747, %v2315_v57  }
 0x231   : > { %2599 = vperm.xlu1 %5747, %v2319_v59  }
 0x2e5   : > { %v5309_v43 = vpop.f32.mrf.mxu0 }
 0x2e7   : > { %v1888_v44 = vpop.f32.mrf.mxu0 }
 0x2e8   : > { %5312 = vmatprep.mubr.msk.f32.mxu0 %vm1897_vm9, %v1888_v44 }
 0x2e9   : > { %5313 = vmatmul.mubr.msk.f32.vlgmr.msra.gmra.mxu0 %vm1897_vm9, %v5309_v43 }
 0x2ea   : > { %5351 = vmatpush3.msra.mxu0 %v6086_v16 }
 0x2eb   : > { %5390 = vmatprep.subr.mxu0 %v6210_v32 }
 0x3a9   : > { %v5314_v45 = vpop.f32.mrf.mxu0 }
 0x3aa   : > { %v6372_v46 = vsub.f32 %v6354_v42, %v5314_v45 }
 0x3ab   : > { %v1970_v47 = vpop.f32.mrf.mxu0 }
 0x3ac   : > { %v6375_v48 = vsub.f32 %v6294_v41, %v1970_v47  ;;  %v1982_v50 = vmul.f32 %v6372_v46, %v6372_v46 }
 0x3ae   : > { %v1981_v49 = vmul.f32 %v6375_v48, %v6375_v48 }
 0x3b0   : > { %5347 = vmatprep.mubr.f32.mxu1 %v1981_v49 }
 0x3b1   : > { %5348 = vmatmul.mubr.f32.vlgmr.msra.gmra.mxu1 %v1982_v50  ;;  %v2409_v50 = vpop.permute.xlu1 %2408 }
 0x3b2   : > { %5356 = vmatpush3.msra.mxu1 %v6081_v15 }
 0x3b3   : > { %5357 = vmatprep.subr.mxu1 %v6072_v14 }
 0x3b4   : > { %5358 = vmatpush3.msra.mxu1 %v6072_v14 }
 0x3b5   : > { %5359 = vmatprep.subr.mxu1 %v6067_v13 }
 0x3b6   : > { %5360 = vmatpush3.msra.mxu1 %v6067_v13 }
 0x3b7   : > { %5361 = vmatprep.subr.mxu1 %v6062_v12 }
 0x3b8   : > { %5362 = vmatpush3.msra.mxu1 %v6062_v12 }
 0x3b9   : > { %5363 = vmatprep.subr.mxu1 %v6049_v11 }
 0x3ba   : > { %5364 = vmatpush3.msra.mxu1 %v6049_v11 }
 0x3bb   : > { %5365 = vmatprep.subr.mxu1 %v6044_v10 }
 0x3bc   : > { %5366 = vmatpush3.msra.mxu1 %v6044_v10 }
 0x3bd   : > { %5367 = vmatprep.subr.mxu1 %v6039_v9 }
 0x3be   : > { %5368 = vmatpush3.msra.mxu1 %v6039_v9 }
 0x3bf   : > { %5369 = vmatprep.subr.mxu1 %v6032_v8 }
 0x3c0   : > { %5370 = vmatpush3.msra.mxu1 %v6032_v8 }
 0x3c1   : > { %5371 = vmatprep.subr.mxu1 %v6027_v7 }
 0x3c2   : > { %5372 = vmatpush3.msra.mxu1 %v6027_v7 }
 0x3c3   : > { %5373 = vmatprep.subr.mxu1 %v6022_v6 }
 0x3c4   : > { %5374 = vmatpush3.msra.mxu1 %v6022_v6 }
 0x3c5   : > { %5375 = vmatprep.subr.mxu1 %v6014_v5 }
 0x3c6   : > { %5376 = vmatpush3.msra.mxu1 %v6014_v5 }
 0x3c7   : > { %5377 = vmatprep.subr.mxu1 %v6009_v4 }
 0x3c8   : > { %5378 = vmatpush3.msra.mxu1 %v6009_v4 }
 0x3c9   : > { %5379 = vmatprep.subr.mxu1 %v6004_v3 }
 0x3ca   : > { %5380 = vmatpush3.msra.mxu1 %v6004_v3 }
 0x3cb   : > { %5381 = vmatprep.subr.mxu1 %v5999_v2 }
 0x3cc   : > { %5382 = vmatpush3.msra.mxu1 %v5999_v2 }
 0x3cd   : > { %5383 = vmatprep.subr.mxu1 %v5994_v1 }
 0x3ce   : > { %5384 = vmatpush3.msra.mxu1 %v5994_v1 }
 0x3cf   : > { %5385 = vmatprep.subr.mxu1 %v5989_v0 }
 0x3d0   : > { %5386 = vmatpush3.msra.mxu1 %v5989_v0 }
 0x471   : > { %v5349_v51 = vpop.f32.mrf.mxu1 }
 0x473   : > { %v2049_v53 = vpop.f32.mrf.mxu1 }
 0x474   : > { %5352 = vmatprep.mubr.msk.f32.mxu0 %vm1897_vm9, %v2049_v53 }
 0x475   : > { %5353 = vmatmul.mubr.msk.f32.vlgmr.msra.gmra.mxu0 %vm1897_vm9, %v5349_v51 }
 0x476   : > { %5391 = vmatpush3.msra.mxu0 %v6210_v32  ;;  %v2310_v32 = vld [vmem:[%s6933_s9] sm:$0xff]  ;;  %s5828_s9 = smov 80  }
 0x477   : > { %5392 = vmatprep.subr.mxu0 %v6205_v31  ;;  %2323 = vperm.xlu0 %5746, %v2310_v32   ;;  %v2497_v32 = vpop.permute.xlu1 %2496 }
 0x478   : > { %5393 = vmatpush3.msra.mxu0 %v6205_v31  ;;  %v5823_v31 = vmov 0.0  }
 0x479   : > { %5394 = vmatprep.subr.mxu0 %v6200_v30  ;;  %5425 = vmatprep.subr.mxu1 %v5823_v31 }
 0x47a   : > { %5395 = vmatpush3.msra.mxu0 %v6200_v30 }
 0x47b   : > { %5396 = vmatprep.subr.mxu0 %v6185_v29  ;;  %v2600_v57 = vpop.permute.xlu1 %2599 }
 0x47c   : > { %5397 = vmatpush3.msra.mxu0 %v6185_v29 }
 0x47d   : > { %5398 = vmatprep.subr.mxu0 %v6180_v28 }
 0x47e   : > { %5399 = vmatpush3.msra.mxu0 %v6180_v28 }
 0x47f   : > { %5400 = vmatprep.subr.mxu0 %v6175_v27 }
 0x480   : > { %5401 = vmatpush3.msra.mxu0 %v6175_v27 }
 0x481   : > { %5402 = vmatprep.subr.mxu0 %v6160_v26 }
 0x482   : > { %5403 = vmatpush3.msra.mxu0 %v6160_v26 }
 0x483   : > { %5404 = vmatprep.subr.mxu0 %v6155_v25 }
 0x484   : > { %5405 = vmatpush3.msra.mxu0 %v6155_v25 }
 0x485   : > { %5406 = vmatprep.subr.mxu0 %v6150_v24 }
 0x486   : > { %5407 = vmatpush3.msra.mxu0 %v6150_v24 }
 0x487   : > { %5408 = vmatprep.subr.mxu0 %v6140_v23 }
 0x488   : > { %5409 = vmatpush3.msra.mxu0 %v6140_v23 }
 0x489   : > { %5410 = vmatprep.subr.mxu0 %v6135_v22 }
 0x48a   : > { %5411 = vmatpush3.msra.mxu0 %v6135_v22 }
 0x48b   : > { %5412 = vmatprep.subr.mxu0 %v6130_v21 }
 0x48c   : > { %5413 = vmatpush3.msra.mxu0 %v6130_v21 }
 0x48d   : > { %5414 = vmatprep.subr.mxu0 %v6117_v20 }
 0x48e   : > { %5415 = vmatpush3.msra.mxu0 %v6117_v20 }
 0x48f   : > { %5416 = vmatprep.subr.mxu0 %v6112_v19 }
 0x490   : > { %5417 = vmatpush3.msra.mxu0 %v6112_v19  ;;  %v4927_v19 = vld [vmem:[%s6929_s14] ss:$0 sm:$0xff]  ;;  %s6936_s14 = scalar_lea.vmem %s6935_s21, %s6076_s26 }
 0x491   : > { %5418 = vmatprep.subr.mxu0 %v6107_v18  ;;  %v2311_v56 = vld [vmem:[%s6936_s14] sm:$0xff] }
 0x492   : > { %5419 = vmatpush3.msra.mxu0 %v6107_v18  ;;  %2402 = vperm.xlu0 %5746, %v2311_v56  }
 0x493   : > { %5420 = vmatprep.subr.mxu0 %v6091_v17 }
 0x494   : > { %5421 = vmatpush3.msra.mxu0 %v6091_v17  ;;  %v4928_v17 = vld [vmem:[%s6931_s1] ss:$0 sm:$0xff]  ;;  %s6938_s1 = scalar_lea.vmem %s6937_s30, %s6076_s26 }
 0x495   : > { %5432 = vmatprep.subr.mxu0 %v5823_v31  ;;  %v2309_v52 = vld [vmem:[%s6938_s1] sm:$0xff] }
 0x496   : > { %2501 = vperm.xlu0 %5746, %v2316_v58  }
 0x49a   : > { %2604 = vperm.xlu0 %5746, %v2320_v60  }
 0x4f2   : > { %v2324_v38 = vpop.permute.xlu0 %2323 }
 0x50d   : > { %v2403_v43 = vpop.permute.xlu0 %2402 }
 0x535   : > { %v5354_v22 = vpop.f32.mrf.mxu0 }
 0x536   : > { %v2136_v21 = vadd.f32 1e-05, %v5354_v22 }
 0x537   : > { %v2130_v23 = vpop.f32.mrf.mxu0 }
 0x538   : > { %5748 = vrsqrt.f32 %v2136_v21  ;;  %v2131_v24 = vadd.f32 1e-05, %v2130_v23 }
 0x53a   : > { %5750 = vrsqrt.f32 %v2131_v24 }
 0x545   : > { %v5749_v20 = vpop.eup %5748 }
 0x546   : > { %v2142_v25 = vmul.f32 %v5749_v20, %v6372_v46 }
 0x547   : > { %v5751_v26 = vpop.eup %5750 }
 0x548   : > { %v2141_v18 = vmul.f32 %v5751_v26, %v6375_v48  ;;  %v2150_v27 = vmul.f32 %v4927_v19, %v2142_v25 }
 0x54a   : > { %v2149_v28 = vmul.f32 %v4927_v19, %v2141_v18  ;;  %v6459_v30 = vadd.f32 %v4928_v17, %v2150_v27 }
 0x54c   : > { %v6457_v29 = vadd.f32 %v4928_v17, %v2149_v28  ;;  %v2314_v17 = vld [vmem:[%s6165_s29 + $0x8] sm:$0xff] }
 0x54d   : > { %v2318_v28 = vld [vmem:[%s6190_s17 + $0x8] sm:$0xff] }
 0x54e   : > { %5387 = vmatprep.mubr.f32.mxu1 %v6457_v29  ;;  %5422 = vmatprep.mubr.f32.mxu0 %v6457_v29 }
 0x54f   : > { %5388 = vmatmul.mubr.f32.vlgmr.msra.gmra.mxu1 %v6459_v30  ;;  %5423 = vmatmul.mubr.f32.vlgmr.msra.gmra.mxu0 %v6459_v30 }
 0x550   : > { %5429 = vmatprep.mubr.msk.f32.mxu1 %vm5824_vm10, %v5823_v31  ;;  %5436 = vmatprep.mubr.msk.f32.mxu0 %vm5824_vm10, %v5823_v31 }
 0x60f   : > { %v5389_v61 = vpop.f32.mrf.mxu1  ;;  %v5424_v62 = vpop.f32.mrf.mxu0 }
 0x610   : > { %5426 = vmatpush3.msra.mxu1 %v5389_v61  ;;  %5433 = vmatpush3.msra.mxu0 %v5424_v62 }
 0x611   : > { %v2225_v63 = vpop.f32.mrf.mxu1  ;;  %v2300_v35 = vpop.f32.mrf.mxu0  ;;  %5427 = vmatprep.subr.mxu1 %v5823_v31  ;;  %5434 = vmatprep.subr.mxu0 %v5823_v31 }
 0x612   : > { %5428 = vmatpush3.msra.mxu1 %v2225_v63  ;;  %5435 = vmatpush3.msra.mxu0 %v2300_v35  ;;  %v2502_v31 = vpop.permute.xlu0 %2501 }
 0x613   : > { %5430 = vmatmul.mubr.msk.f32.vlgmr.msra.gmra.mxu1 %vm2326_vm11, %v2309_v52  ;;  %5437 = vmatmul.mubr.msk.f32.vlgmr.msra.gmra.mxu0 %vm2326_vm11, %v2309_v52 }
 0x614   : > { %5441 = vmatprep.mubr.msk.f32.mxu1 %vm1897_vm9, %v2313_v36  ;;  %5446 = vmatprep.mubr.msk.f32.mxu0 %vm1897_vm9, %v2317_v37 }
 0x616   : > { %v2605_v54 = vpop.permute.xlu0 %2604 }
 0x6d3   : > { %v2396_v39 = vpop.f32.mrf.mxu1  ;;  %v2483_v40 = vpop.f32.mrf.mxu0 }
 0x6d4   : > { %v2397_v44 = vadd.f32 %v2396_v39, %v2324_v38  ;;  %v2484_v45 = vadd.f32 %v2483_v40, %v2324_v38 }
 0x6d5   : > { %v5431_v46 = vpop.f32.mrf.mxu1  ;;  %v5438_v47 = vpop.f32.mrf.mxu0 }
 0x6d6   : > { %v2405_v48 = vmul.f32 %v2403_v43, %v2397_v44  ;;  %v2487_v49 = vmul.f32 %v2484_v45, %v2403_v43 }
 0x6d8   : > { %v2411_v51 = vadd.f32 %v2409_v50, %v2405_v48  ;;  %v2488_v53 = vadd.f32 %v2487_v49, %v2409_v50 }
 0x6da   : > { %v2412_v22 = vadd.f32 3.0, %v2411_v51  ;;  %v2489_v21 = vadd.f32 3.0, %v2488_v53 }
 0x6dc   : > { %v2413_v23 = vmax.f32 %v2412_v22, 0.0  ;;  %v2490_v24 = vmax.f32 %v2489_v21, 0.0 }
 0x6de   : > { %v2414_v20 = vmin.f32 %v2413_v23, 6.0  ;;  %v2491_v19 = vmin.f32 %v2490_v24, 6.0 }
 0x6e0   : > { %v2415_v25 = vmul.f32 0.16666667, %v2414_v20  ;;  %v2492_v26 = vmul.f32 0.16666667, %v2491_v19 }
 0x6e2   : > { %v2416_v18 = vmul.f32 %v2415_v25, %v2411_v51  ;;  %v2493_v27 = vmul.f32 %v2492_v26, %v2488_v53 }
 0x6e4   : > { %5439 = vmatprep.subr.mxu1 %v2416_v18  ;;  %5444 = vmatprep.subr.mxu0 %v2493_v27 }
 0x6e5   : > { %5440 = vmatpush3.msra.mxu1 %v2416_v18  ;;  %5445 = vmatpush3.msra.mxu0 %v2493_v27 }
 0x6e6   : > { %5442 = vmatmul.mubr.msk.f32.vlgmr.msra.gmra.mxu1 %vm1897_vm9, %v2314_v17  ;;  %5447 = vmatmul.mubr.msk.f32.vlgmr.msra.gmra.mxu0 %vm1897_vm9, %v2318_v28 }
 0x6e7   : > { %5454 = vmatprep.subr.mxu0 %v6228_v34  ;;  %5449 = vmatprep.subr.mxu1 %v6086_v16 }
 0x6e8   : > { %5455 = vmatpush3.msra.mxu0 %v6228_v34  ;;  %5450 = vmatpush3.msra.mxu1 %v6086_v16 }
 0x6e9   : > { %5456 = vmatprep.subr.mxu0 %v6223_v33  ;;  %5461 = vmatprep.subr.mxu1 %v6081_v15 }
 0x6ea   : > { %5457 = vmatpush3.msra.mxu0 %v6223_v33 }
 0x6eb   : > { %5496 = vmatprep.subr.mxu0 %v6086_v16 }
 0x7a6   : > { %v5443_v55 = vpop.f32.mrf.mxu1  ;;  %v5448_v56 = vpop.f32.mrf.mxu0 }
 0x7a7   : > { %v2582_v58 = vadd.f32 %v5443_v55, %v2502_v31  ;;  %v2685_v59 = vadd.f32 %v5448_v56, %v2605_v54  ;;  %v6634_v31 = vld [vmem:[%s6247_s4 + $0x18] sm:$0xff]  ;;  %v6645_v54 = vld [vmem:[%s6247_s4 + $0x8] sm:$0xff]  ;;  %v6649_v55 = vld [vmem:[%s6247_s4] sm:$0xff] }
 0x7a8   : > { %v2576_v60 = vpop.f32.mrf.mxu1  ;;  %v2679_v34 = vpop.f32.mrf.mxu0 }
 0x7a9   : > { %v4934_v61 = vmul.f32 -1.442695, %v2582_v58  ;;  %v4938_v62 = vmul.f32 -1.442695, %v2685_v59  ;;  %v2577_v52 = vadd.f32 %v2576_v60, %v2497_v32  ;;  %v2680_v63 = vadd.f32 %v2679_v34, %v2600_v57  ;;  %v6640_v32 = vld [vmem:[%s6247_s4 + $0x10] sm:$0xff] }
 0x7aa   : > { %v6670_v58 = vld [vmem:[%s983_s10] ss:$0 sm:$0xff] }
 0x7ab   : > { %5752 = vpow2.f32 %v4934_v61  ;;  %v4933_v35 = vmul.f32 -1.442695, %v2577_v52  ;;  %v4937_v36 = vmul.f32 -1.442695, %v2680_v63 }
 0x7ac   : > { %5754 = vpow2.f32 %v4938_v62 }
 0x7ad   : > { %5756 = vpow2.f32 %v4933_v35 }
 0x7ae   : > { %5758 = vpow2.f32 %v4937_v36 }
 0x7b8   : > { %v5753_v33 = vpop.eup %5752 }
 0x7b9   : > { %v5755_v37 = vpop.eup %5754  ;;  %v2592_v38 = vadd.f32 1.0, %v5753_v33 }
 0x7ba   : > { %v5757_v39 = vpop.eup %5756  ;;  %v2695_v43 = vadd.f32 1.0, %v5755_v37 }
 0x7bb   : > { %v5759_v40 = vpop.eup %5758  ;;  %v2591_v44 = vadd.f32 1.0, %v5757_v39  ;;  %5760 = vrcp.f32 %v2592_v38 }
 0x7bc   : > { %v2694_v45 = vadd.f32 1.0, %v5759_v40 }
 0x7bd   : > { %5762 = vrcp.f32 %v2591_v44 }
 0x7be   : > { %5764 = vrcp.f32 %v2694_v45 }
 0x7bf   : > { %5766 = vrcp.f32 %v2695_v43 }
 0x7c8   : > { %v5761_v46 = vpop.eup %5760 }
 0x7ca   : > { %v5763_v47 = vpop.eup %5762 }
 0x7cb   : > { %v5765_v48 = vpop.eup %5764  ;;  %5451 = vmatprep.mubr.msk.f32.mxu1 %vm1897_vm9, %v5763_v47 }
 0x7cc   : > { %v5767_v49 = vpop.eup %5766  ;;  %5458 = vmatprep.mubr.msk.f32.mxu0 %vm2326_vm11, %v5765_v48  ;;  %5452 = vmatmul.mubr.msk.f32.vlgmr.msra.gmra.mxu1 %vm1897_vm9, %v5761_v46 }
 0x7cd   : > { %5459 = vmatmul.mubr.msk.f32.vlgmr.msra.gmra.mxu0 %vm2326_vm11, %v5767_v49  ;;  %5462 = vmatpush3.msra.mxu1 %v6081_v15 }
 0x7ce   : > { %5463 = vmatprep.subr.mxu1 %v6072_v14  ;;  %5497 = vmatpush3.msra.mxu0 %v6086_v16 }
 0x7cf   : > { %5464 = vmatpush3.msra.mxu1 %v6072_v14  ;;  %5501 = vmatprep.subr.mxu0 %v6081_v15 }
 0x7d0   : > { %5465 = vmatprep.subr.mxu1 %v6067_v13 }
 0x7d1   : > { %5466 = vmatpush3.msra.mxu1 %v6067_v13 }
 0x7d2   : > { %5467 = vmatprep.subr.mxu1 %v6062_v12 }
 0x7d3   : > { %5468 = vmatpush3.msra.mxu1 %v6062_v12 }
 0x7d4   : > { %5469 = vmatprep.subr.mxu1 %v6049_v11 }
 0x7d5   : > { %5470 = vmatpush3.msra.mxu1 %v6049_v11 }
 0x7d6   : > { %5471 = vmatprep.subr.mxu1 %v6044_v10 }
 0x7d7   : > { %5472 = vmatpush3.msra.mxu1 %v6044_v10 }
 0x7d8   : > { %5473 = vmatprep.subr.mxu1 %v6039_v9 }
 0x7d9   : > { %5474 = vmatpush3.msra.mxu1 %v6039_v9 }
 0x7da   : > { %5475 = vmatprep.subr.mxu1 %v6032_v8 }
 0x7db   : > { %5476 = vmatpush3.msra.mxu1 %v6032_v8 }
 0x7dc   : > { %5477 = vmatprep.subr.mxu1 %v6027_v7 }
 0x7dd   : > { %5478 = vmatpush3.msra.mxu1 %v6027_v7 }
 0x7de   : > { %5479 = vmatprep.subr.mxu1 %v6022_v6 }
 0x7df   : > { %5480 = vmatpush3.msra.mxu1 %v6022_v6 }
 0x7e0   : > { %5481 = vmatprep.subr.mxu1 %v6014_v5 }
 0x7e1   : > { %5482 = vmatpush3.msra.mxu1 %v6014_v5 }
 0x7e2   : > { %5483 = vmatprep.subr.mxu1 %v6009_v4 }
 0x7e3   : > { %5484 = vmatpush3.msra.mxu1 %v6009_v4 }
 0x7e4   : > { %5485 = vmatprep.subr.mxu1 %v6004_v3 }
 0x7e5   : > { %5486 = vmatpush3.msra.mxu1 %v6004_v3 }
 0x7e6   : > { %5487 = vmatprep.subr.mxu1 %v5999_v2 }
 0x7e7   : > { %5488 = vmatpush3.msra.mxu1 %v5999_v2 }
 0x7e8   : > { %5489 = vmatprep.subr.mxu1 %v5994_v1 }
 0x7e9   : > { %5490 = vmatpush3.msra.mxu1 %v5994_v1 }
 0x7ea   : > { %5491 = vmatprep.subr.mxu1 %v5989_v0 }
 0x7eb   : > { %5492 = vmatpush3.msra.mxu1 %v5989_v0 }
 0x7ec   : > { %5536 = vmatprep.subr.mxu1 %v6086_v16 }
 0x88c   : > { %v5453_v50 = vpop.f32.mrf.mxu1 }
 0x88d   : > { %v2863_v51 = vmul.f32 %v5453_v50, %v6459_v30  ;;  %v5460_v53 = vpop.f32.mrf.mxu0 }
 0x88e   : > { %v2772_v22 = vpop.f32.mrf.mxu1 }
 0x88f   : > { %v2862_v21 = vmul.f32 %v2772_v22, %v6457_v29  ;;  %v2865_v23 = vmul.f32 %v5460_v53, %v2863_v51  ;;  %v2853_v24 = vpop.f32.mrf.mxu0 }
 0x891   : > { %v2864_v20 = vmul.f32 %v2862_v21, %v2853_v24  ;;  %v6551_v25 = vadd.f32 %v2865_v23, %v6354_v42  ;;  %v4948_v42 = vld [vmem:[%s6941_s19] ss:$0 sm:$0xff] }
 0x892   : > { %v6735_v23 = vld [vmem:[%s991_s11] ss:$0 sm:$0xff] }
 0x893   : > { %v6548_v19 = vadd.f32 %v2864_v20, %v6294_v41 }
 0x895   : > { %5493 = vmatprep.mubr.f32.mxu1 %v6548_v19 }
 0x896   : > { %5494 = vmatmul.mubr.f32.vlgmr.msra.gmra.mxu1 %v6551_v25 }
 0x897   : > { %5537 = vmatpush3.msra.mxu1 %v6086_v16 }
 0x956   : > { %v5495_v30 = vpop.f32.mrf.mxu1 }
 0x958   : > { %v2936_v26 = vpop.f32.mrf.mxu1 }
 0x959   : > { %5498 = vmatprep.mubr.msk.f32.mxu0 %vm1897_vm9, %v2936_v26 }
 0x95a   : > { %5499 = vmatmul.mubr.msk.f32.vlgmr.msra.gmra.mxu0 %vm1897_vm9, %v5495_v30 }
 0x95b   : > { %5502 = vmatpush3.msra.mxu0 %v6081_v15 }
 0x95c   : > { %5503 = vmatprep.subr.mxu0 %v6072_v14 }
 0x95d   : > { %5504 = vmatpush3.msra.mxu0 %v6072_v14 }
 0x95e   : > { %5505 = vmatprep.subr.mxu0 %v6067_v13 }
 0x95f   : > { %5506 = vmatpush3.msra.mxu0 %v6067_v13 }
 0x960   : > { %5507 = vmatprep.subr.mxu0 %v6062_v12 }
 0x961   : > { %5508 = vmatpush3.msra.mxu0 %v6062_v12 }
 0x962   : > { %5509 = vmatprep.subr.mxu0 %v6049_v11 }
 0x963   : > { %5510 = vmatpush3.msra.mxu0 %v6049_v11 }
 0x964   : > { %5511 = vmatprep.subr.mxu0 %v6044_v10 }
 0x965   : > { %5512 = vmatpush3.msra.mxu0 %v6044_v10 }
 0x966   : > { %5513 = vmatprep.subr.mxu0 %v6039_v9 }
 0x967   : > { %5514 = vmatpush3.msra.mxu0 %v6039_v9 }
 0x968   : > { %5515 = vmatprep.subr.mxu0 %v6032_v8 }
 0x969   : > { %5516 = vmatpush3.msra.mxu0 %v6032_v8 }
 0x96a   : > { %5517 = vmatprep.subr.mxu0 %v6027_v7 }
 0x96b   : > { %5518 = vmatpush3.msra.mxu0 %v6027_v7 }
 0x96c   : > { %5519 = vmatprep.subr.mxu0 %v6022_v6 }
 0x96d   : > { %5520 = vmatpush3.msra.mxu0 %v6022_v6 }
 0x96e   : > { %5521 = vmatprep.subr.mxu0 %v6014_v5 }
 0x96f   : > { %5522 = vmatpush3.msra.mxu0 %v6014_v5 }
 0x970   : > { %5523 = vmatprep.subr.mxu0 %v6009_v4 }
 0x971   : > { %5524 = vmatpush3.msra.mxu0 %v6009_v4 }
 0x972   : > { %5525 = vmatprep.subr.mxu0 %v6004_v3 }
 0x973   : > { %5526 = vmatpush3.msra.mxu0 %v6004_v3 }
 0x974   : > { %5527 = vmatprep.subr.mxu0 %v5999_v2 }
 0x975   : > { %5528 = vmatpush3.msra.mxu0 %v5999_v2 }
 0x976   : > { %5529 = vmatprep.subr.mxu0 %v5994_v1 }
 0x977   : > { %5530 = vmatpush3.msra.mxu0 %v5994_v1  ;;  %v6594_v1 = vld [vmem:[%s6233_s12 + $0x8] sm:$0xff] }
 0x978   : > { %5531 = vmatprep.subr.mxu0 %v5989_v0  ;;  %5541 = vmatprep.subr.mxu1 %v6594_v1 }
 0x979   : > { %5532 = vmatpush3.msra.mxu0 %v5989_v0  ;;  %v6598_v0 = vld [vmem:[%s6233_s12] sm:$0xff]  ;;  %s6939_s12 = scalar_lea.vmem %s6866_s13, %s6017_s28  ;;  %s6942_s28 = sld [smem:[#allocation3_spill]] }
 0x97a   : > { %v4947_v15 = vld [vmem:[%s6939_s12] ss:$0 sm:$0xff]  ;;  %5548 = vmatprep.subr.mxu0 %v6634_v31 }
 0x97f   : > { %p4983_p8 = scmp.ne.s32.totalorder %s6942_s28, 2 }
 0xa1a   : > { %v5500_v5 = vpop.f32.mrf.mxu0 }
 0xa1b   : > { %v3027_v4 = vsub.f32 %v6551_v25, %v5500_v5 }
 0xa1c   : > { %v3017_v6 = vpop.f32.mrf.mxu0 }
 0xa1d   : > { %v3026_v3 = vsub.f32 %v6548_v19, %v3017_v6  ;;  %v3029_v8 = vmul.f32 %v3027_v4, %v3027_v4 }
 0xa1f   : > { %v3028_v7 = vmul.f32 %v3026_v3, %v3026_v3 }
 0xa21   : > { %5533 = vmatprep.mubr.f32.mxu0 %v3028_v7 }
 0xa22   : > { %5534 = vmatmul.mubr.f32.vlgmr.msra.gmra.mxu0 %v3029_v8 }
 0xa23   : > { %5549 = vmatpush3.msra.mxu0 %v6634_v31 }
 0xa24   : > { %5550 = vmatprep.subr.mxu0 %v6640_v32 }
 0xa25   : > { %5551 = vmatpush3.msra.mxu0 %v6640_v32 }
 0xa26   : > { %5552 = vmatprep.subr.mxu0 %v6645_v54 }
 0xa27   : > { %5553 = vmatpush3.msra.mxu0 %v6645_v54 }
 0xa28   : > { %5554 = vmatprep.subr.mxu0 %v6649_v55 }
 0xa29   : > { %5555 = vmatpush3.msra.mxu0 %v6649_v55 }
 0xa2a   : > { %5577 = vmatprep.subr.mxu0 %v6594_v1 }
 0xae2   : > { %v5535_v2 = vpop.f32.mrf.mxu0 }
 0xae4   : > { %v3096_v9 = vpop.f32.mrf.mxu0 }
 0xae5   : > { %5538 = vmatprep.mubr.msk.f32.mxu1 %vm1897_vm9, %v3096_v9 }
 0xae6   : > { %5539 = vmatmul.mubr.msk.f32.vlgmr.msra.gmra.mxu1 %vm1897_vm9, %v5535_v2 }
 0xae7   : > { %5542 = vmatpush3.msra.mxu1 %v6594_v1 }
 0xae8   : > { %5543 = vmatprep.subr.mxu1 %v6598_v0 }
 0xae9   : > { %5544 = vmatpush3.msra.mxu1 %v6598_v0 }
 0xaea   : > { %5559 = vmatprep.subr.mxu1 %v6594_v1 }
 0xba6   : > { %v5540_v10 = vpop.f32.mrf.mxu1 }
 0xba7   : > { %v3183_v11 = vadd.f32 1e-05, %v5540_v10 }
 0xba8   : > { %v3177_v12 = vpop.f32.mrf.mxu1 }
 0xba9   : > { %5768 = vrsqrt.f32 %v3183_v11  ;;  %v3178_v13 = vadd.f32 1e-05, %v3177_v12 }
 0xbab   : > { %5770 = vrsqrt.f32 %v3178_v13 }
 0xbb6   : > { %v5769_v14 = vpop.eup %5768 }
 0xbb7   : > { %v3189_v16 = vmul.f32 %v5769_v14, %v3027_v4 }
 0xbb8   : > { %v5771_v41 = vpop.eup %5770 }
 0xbb9   : > { %v3197_v29 = vmul.f32 %v4947_v15, %v3189_v16  ;;  %v3188_v18 = vmul.f32 %v5771_v41, %v3026_v3 }
 0xbbb   : > { %v3205_v27 = vadd.f32 %v4948_v42, %v3197_v29  ;;  %v3196_v17 = vmul.f32 %v4947_v15, %v3188_v18 }
 0xbbd   : > { %v3204_v28 = vadd.f32 %v4948_v42, %v3196_v17  ;;  %3393 = vrot.lane.b32.xlu0 %v3205_v27, %s5826_s23 }
 0xbbf   : > { %3391 = vrot.lane.b32.xlu1 %v3204_v28, %s5826_s23  ;;  %5545 = vmatprep.mubr.msk.f32.mxu1 %vm2326_vm11, %v3204_v28 }
 0xbc0   : > { %5546 = vmatmul.mubr.msk.f32.vlgmr.msra.gmra.mxu1 %vm2326_vm11, %v3205_v27 }
 0xbc1   : > { %3559 = vrot.lane.b32.xlu0 %v3205_v27, %s5827_s27  ;;  %5560 = vmatpush3.msra.mxu1 %v6594_v1 }
 0xbc2   : > { %5561 = vmatprep.subr.mxu1 %v6598_v0 }
 0xbc3   : > { %3557 = vrot.lane.b32.xlu1 %v3204_v28, %s5827_s27  ;;  %5562 = vmatpush3.msra.mxu1 %v6598_v0 }
 0xbc4   : > { %5566 = vmatprep.subr.mxu1 %v6634_v31 }
 0xbc5   : > { %3725 = vrot.lane.b32.xlu0 %v3205_v27, %s5828_s9 }
 0xbc7   : > { %3723 = vrot.lane.b32.xlu1 %v3204_v28, %s5828_s9 }
 0xbc9   : > { %3891 = vrot.lane.b32.xlu0 %v3205_v27, %s5829_s7 }
 0xbcb   : > { %3889 = vrot.lane.b32.xlu1 %v3204_v28, %s5829_s7 }
 0xbcd   : > { %4057 = vrot.lane.b32.xlu0 %v3205_v27, %s5830_s3 }
 0xbcf   : > { %4055 = vrot.lane.b32.xlu1 %v3204_v28, %s5830_s3 }
 0xbd1   : > { %4223 = vrot.lane.b32.xlu0 %v3205_v27, %s5831_s6 }
 0xbd3   : > { %4221 = vrot.lane.b32.xlu1 %v3204_v28, %s5831_s6 }
 0xbd5   : > { %4389 = vrot.lane.b32.xlu0 %v3205_v27, %s5832_s24 }
 0xbd7   : > { %4387 = vrot.lane.b32.xlu1 %v3204_v28, %s5832_s24 }
 0xc2f   : > { %v3394_v57 = vpop.permute.xlu0 %3393 }
 0xc31   : > { %v3392_v56 = vpop.permute.xlu1 %3391 }
 0xc32   : > { %5563 = vmatprep.mubr.msk.f32.mxu1 %vm2326_vm11, %v3392_v56 }
 0xc33   : > { %5564 = vmatmul.mubr.msk.f32.vlgmr.msra.gmra.mxu1 %vm2326_vm11, %v3394_v57  ;;  %v3560_v35 = vpop.permute.xlu0 %3559 }
 0xc34   : > { %5567 = vmatpush3.msra.mxu1 %v6634_v31 }
 0xc35   : > { %5568 = vmatprep.subr.mxu1 %v6640_v32  ;;  %v3558_v63 = vpop.permute.xlu1 %3557 }
 0xc36   : > { %5569 = vmatpush3.msra.mxu1 %v6640_v32 }
 0xc37   : > { %5570 = vmatprep.subr.mxu1 %v6645_v54  ;;  %v3726_v44 = vpop.permute.xlu0 %3725 }
 0xc38   : > { %5571 = vmatpush3.msra.mxu1 %v6645_v54 }
 0xc39   : > { %5572 = vmatprep.subr.mxu1 %v6649_v55  ;;  %v3724_v43 = vpop.permute.xlu1 %3723 }
 0xc3a   : > { %5573 = vmatpush3.msra.mxu1 %v6649_v55 }
 0xc3b   : > { %5595 = vmatprep.subr.mxu1 %v6594_v1  ;;  %v3892_v21 = vpop.permute.xlu0 %3891 }
 0xc3d   : > { %v3890_v22 = vpop.permute.xlu1 %3889 }
 0xc3f   : > { %v4058_v9 = vpop.permute.xlu0 %4057 }
 0xc41   : > { %v4056_v2 = vpop.permute.xlu1 %4055 }
 0xc43   : > { %v4224_v27 = vpop.permute.xlu0 %4223 }
 0xc45   : > { %v4222_v18 = vpop.permute.xlu1 %4221 }
 0xc80   : > { %v5547_v59 = vpop.f32.mrf.mxu1 }
 0xc81   : > { %v3298_v60 = vadd.f32 %v5547_v59, %v6670_v58 }
 0xc82   : > { %v3292_v34 = vpop.f32.mrf.mxu1 }
 0xc83   : > { %v3293_v61 = vadd.f32 %v6670_v58, %v3292_v34  ;;  %v3302_v52 = vmax.f32 %v3298_v60, 0.0 }
 0xc85   : > { %v3301_v62 = vmax.f32 %v3293_v61, 0.0 }
 0xc87   : > { %5556 = vmatprep.mubr.msk.f32.mxu0 %vm3309_vm12, %v3301_v62 }
 0xc88   : > { %5557 = vmatmul.mubr.msk.f32.vlgmr.msra.gmra.mxu0 %vm3309_vm12, %v3302_v52 }
 0xc89   : > { %5578 = vmatpush3.msra.mxu0 %v6594_v1  ;;  %5581 = vmatprep.mubr.msk.f32.mxu0 %vm2326_vm11, %v3558_v63  ;;  %v4388_v63 = vpop.permute.xlu1 %4387 }
 0xc8a   : > { %5579 = vmatprep.subr.mxu0 %v6598_v0 }
 0xc8b   : > { %5580 = vmatpush3.msra.mxu0 %v6598_v0 }
 0xc8c   : > { %5582 = vmatmul.mubr.msk.f32.vlgmr.msra.gmra.mxu0 %vm2326_vm11, %v3560_v35  ;;  %5584 = vmatprep.subr.mxu0 %v6634_v31  ;;  %v4390_v35 = vpop.permute.xlu0 %4389 }
 0xc8d   : > { %5585 = vmatpush3.msra.mxu0 %v6634_v31 }
 0xc8e   : > { %5586 = vmatprep.subr.mxu0 %v6640_v32 }
 0xc8f   : > { %5587 = vmatpush3.msra.mxu0 %v6640_v32 }
 0xc90   : > { %5588 = vmatprep.subr.mxu0 %v6645_v54 }
 0xc91   : > { %5589 = vmatpush3.msra.mxu0 %v6645_v54 }
 0xc92   : > { %5590 = vmatprep.subr.mxu0 %v6649_v55 }
 0xc93   : > { %5591 = vmatpush3.msra.mxu0 %v6649_v55 }
 0xc94   : > { %5613 = vmatprep.subr.mxu0 %v6594_v1 }
 0xcf3   : > { %v5565_v36 = vpop.f32.mrf.mxu1 }
 0xcf4   : > { %v3471_v33 = vadd.f32 %v5565_v36, %v6670_v58 }
 0xcf5   : > { %v3465_v37 = vpop.f32.mrf.mxu1 }
 0xcf6   : > { %v3466_v38 = vadd.f32 %v6670_v58, %v3465_v37  ;;  %v3475_v40 = vmax.f32 %v3471_v33, 0.0 }
 0xcf8   : > { %v3474_v39 = vmax.f32 %v3466_v38, 0.0 }
 0xcfa   : > { %5574 = vmatprep.mubr.msk.f32.mxu1 %vm3309_vm12, %v3474_v39 }
 0xcfb   : > { %5575 = vmatmul.mubr.msk.f32.vlgmr.msra.gmra.mxu1 %vm3309_vm12, %v3475_v40 }
 0xcfc   : > { %5596 = vmatpush3.msra.mxu1 %v6594_v1  ;;  %5599 = vmatprep.mubr.msk.f32.mxu1 %vm2326_vm11, %v3724_v43 }
 0xcfd   : > { %5597 = vmatprep.subr.mxu1 %v6598_v0 }
 0xcfe   : > { %5598 = vmatpush3.msra.mxu1 %v6598_v0 }
 0xcff   : > { %5600 = vmatmul.mubr.msk.f32.vlgmr.msra.gmra.mxu1 %vm2326_vm11, %v3726_v44  ;;  %5602 = vmatprep.subr.mxu1 %v6634_v31 }
 0xd00   : > { %5603 = vmatpush3.msra.mxu1 %v6634_v31 }
 0xd01   : > { %5604 = vmatprep.subr.mxu1 %v6640_v32 }
 0xd02   : > { %5605 = vmatpush3.msra.mxu1 %v6640_v32 }
 0xd03   : > { %5606 = vmatprep.subr.mxu1 %v6645_v54 }
 0xd04   : > { %5607 = vmatpush3.msra.mxu1 %v6645_v54 }
 0xd05   : > { %5608 = vmatprep.subr.mxu1 %v6649_v55 }
 0xd06   : > { %5609 = vmatpush3.msra.mxu1 %v6649_v55 }
 0xd07   : > { %5631 = vmatprep.subr.mxu1 %v6594_v1 }
 0xd48   : > { %v6708_v45 = vpop.f32.mrf.mxu0 }
 0xd4a   : > { %v6710_v46 = vpop.f32.mrf.mxu0 }
 0xd4c   : > { %v5583_v47 = vpop.f32.mrf.mxu0 }
 0xd4d   : > { %v3637_v48 = vadd.f32 %v5583_v47, %v6670_v58 }
 0xd4e   : > { %v3631_v49 = vpop.f32.mrf.mxu0 }
 0xd4f   : > { %v3632_v50 = vadd.f32 %v6670_v58, %v3631_v49  ;;  %v3641_v53 = vmax.f32 %v3637_v48, 0.0 }
 0xd51   : > { %v3640_v51 = vmax.f32 %v3632_v50, 0.0 }
 0xd53   : > { %5592 = vmatprep.mubr.msk.f32.mxu0 %vm3309_vm12, %v3640_v51 }
 0xd54   : > { %5593 = vmatmul.mubr.msk.f32.vlgmr.msra.gmra.mxu0 %vm3309_vm12, %v3641_v53 }
 0xd55   : > { %5614 = vmatpush3.msra.mxu0 %v6594_v1  ;;  %5617 = vmatprep.mubr.msk.f32.mxu0 %vm2326_vm11, %v3890_v22 }
 0xd56   : > { %5615 = vmatprep.subr.mxu0 %v6598_v0 }
 0xd57   : > { %5616 = vmatpush3.msra.mxu0 %v6598_v0 }
 0xd58   : > { %5618 = vmatmul.mubr.msk.f32.vlgmr.msra.gmra.mxu0 %vm2326_vm11, %v3892_v21  ;;  %5620 = vmatprep.subr.mxu0 %v6634_v31 }
 0xd59   : > { %5621 = vmatpush3.msra.mxu0 %v6634_v31 }
 0xd5a   : > { %5622 = vmatprep.subr.mxu0 %v6640_v32 }
 0xd5b   : > { %5623 = vmatpush3.msra.mxu0 %v6640_v32 }
 0xd5c   : > { %5624 = vmatprep.subr.mxu0 %v6645_v54 }
 0xd5d   : > { %5625 = vmatpush3.msra.mxu0 %v6645_v54 }
 0xd5e   : > { %5626 = vmatprep.subr.mxu0 %v6649_v55 }
 0xd5f   : > { %5627 = vmatpush3.msra.mxu0 %v6649_v55 }
 0xd60   : > { %5649 = vmatprep.subr.mxu0 %v6594_v1 }
 0xdbb   : > { %v5576_v24 = vpop.f32.mrf.mxu1 }
 0xdbc   : > { %v3554_v20 = vadd.f32 %v5576_v24, %v6735_v23 }
 0xdbd   : > { %v3548_v30 = vpop.f32.mrf.mxu1 }
 0xdbe   : > { %v3549_v26 = vadd.f32 %v6735_v23, %v3548_v30  ;;  %4557 = vrot.lane.b32.xlu0 %v3554_v20, %s5832_s24 }
 0xdbf   : > { %v5601_v5 = vpop.f32.mrf.mxu1 }
 0xdc0   : > { %4555 = vrot.lane.b32.xlu1 %v3549_v26, %s5832_s24  ;;  %v3803_v4 = vadd.f32 %v5601_v5, %v6670_v58 }
 0xdc1   : > { %v3797_v6 = vpop.f32.mrf.mxu1 }
 0xdc2   : > { %v3798_v3 = vadd.f32 %v6670_v58, %v3797_v6  ;;  %v3807_v8 = vmax.f32 %v3803_v4, 0.0 }
 0xdc4   : > { %v3806_v7 = vmax.f32 %v3798_v3, 0.0 }
 0xdc6   : > { %5610 = vmatprep.mubr.msk.f32.mxu1 %vm3309_vm12, %v3806_v7 }
 0xdc7   : > { %5611 = vmatmul.mubr.msk.f32.vlgmr.msra.gmra.mxu1 %vm3309_vm12, %v3807_v8 }
 0xdc8   : > { %5632 = vmatpush3.msra.mxu1 %v6594_v1  ;;  %5635 = vmatprep.mubr.msk.f32.mxu1 %vm2326_vm11, %v4056_v2 }
 0xdc9   : > { %5633 = vmatprep.subr.mxu1 %v6598_v0 }
 0xdca   : > { %5634 = vmatpush3.msra.mxu1 %v6598_v0 }
 0xdcb   : > { %5636 = vmatmul.mubr.msk.f32.vlgmr.msra.gmra.mxu1 %vm2326_vm11, %v4058_v9  ;;  %5638 = vmatprep.subr.mxu1 %v6634_v31 }
 0xdcc   : > { %5639 = vmatpush3.msra.mxu1 %v6634_v31 }
 0xdcd   : > { %5640 = vmatprep.subr.mxu1 %v6640_v32 }
 0xdce   : > { %5641 = vmatpush3.msra.mxu1 %v6640_v32 }
 0xdcf   : > { %5642 = vmatprep.subr.mxu1 %v6645_v54 }
 0xdd0   : > { %5643 = vmatpush3.msra.mxu1 %v6645_v54 }
 0xdd1   : > { %5644 = vmatprep.subr.mxu1 %v6649_v55 }
 0xdd2   : > { %5645 = vmatpush3.msra.mxu1 %v6649_v55 }
 0xdd3   : > { %5667 = vmatprep.subr.mxu1 %v6594_v1 }
 0xe14   : > { %v5594_v10 = vpop.f32.mrf.mxu0 }
 0xe15   : > { %v3720_v11 = vadd.f32 %v5594_v10, %v6735_v23 }
 0xe16   : > { %v3714_v12 = vpop.f32.mrf.mxu0 }
 0xe17   : > { %v3715_v13 = vadd.f32 %v6735_v23, %v3714_v12  ;;  %4565 = vrot.lane.b32.xlu0 %v3720_v11, %s5831_s6  ;;  %v3388_v12 = vadd.f32 %v6708_v45, %v6735_v23 }
 0xe18   : > { %v5619_v14 = vpop.f32.mrf.mxu0 }
 0xe19   : > { %4563 = vrot.lane.b32.xlu1 %v3715_v13, %s5831_s6  ;;  %v3969_v15 = vadd.f32 %v5619_v14, %v6670_v58  ;;  %v3383_v14 = vadd.f32 %v6735_v23, %v6710_v46 }
 0xe1a   : > { %v3963_v16 = vpop.f32.mrf.mxu0 }
 0xe1b   : > { %v3964_v41 = vadd.f32 %v6670_v58, %v3963_v16  ;;  %v3973_v29 = vmax.f32 %v3969_v15, 0.0 }
 0xe1d   : > { %v3972_v42 = vmax.f32 %v3964_v41, 0.0 }
 0xe1f   : > { %5628 = vmatprep.mubr.msk.f32.mxu0 %vm3309_vm12, %v3972_v42 }
 0xe20   : > { %5629 = vmatmul.mubr.msk.f32.vlgmr.msra.gmra.mxu0 %vm3309_vm12, %v3973_v29 }
 0xe21   : > { %5650 = vmatpush3.msra.mxu0 %v6594_v1  ;;  %5653 = vmatprep.mubr.msk.f32.mxu0 %vm2326_vm11, %v4222_v18 }
 0xe22   : > { %5651 = vmatprep.subr.mxu0 %v6598_v0 }
 0xe23   : > { %5652 = vmatpush3.msra.mxu0 %v6598_v0 }
 0xe24   : > { %5654 = vmatmul.mubr.msk.f32.vlgmr.msra.gmra.mxu0 %vm2326_vm11, %v4224_v27  ;;  %5656 = vmatprep.subr.mxu0 %v6634_v31 }
 0xe25   : > { %5657 = vmatpush3.msra.mxu0 %v6634_v31 }
 0xe26   : > { %5658 = vmatprep.subr.mxu0 %v6640_v32 }
 0xe27   : > { %5659 = vmatpush3.msra.mxu0 %v6640_v32 }
 0xe28   : > { %5660 = vmatprep.subr.mxu0 %v6645_v54 }
 0xe29   : > { %5661 = vmatpush3.msra.mxu0 %v6645_v54 }
 0xe2a   : > { %5662 = vmatprep.subr.mxu0 %v6649_v55 }
 0xe2b   : > { %5663 = vmatpush3.msra.mxu0 %v6649_v55 }
 0xe30   : > { %v4558_v4 = vpop.permute.xlu0 %4557 }
 0xe31   : > { %v4610_v15 = vsel %vm2326_vm11, %v3388_v12, %v4558_v4 }
 0xe32   : > { %v4556_v6 = vpop.permute.xlu1 %4555 }
 0xe33   : > { %v4609_v42 = vsel %vm2326_vm11, %v3383_v14, %v4556_v6 }
 0xe87   : > { %v5612_v17 = vpop.f32.mrf.mxu1 }
 0xe88   : > { %v3886_v28 = vadd.f32 %v5612_v17, %v6735_v23 }
 0xe89   : > { %v3880_v56 = vpop.f32.mrf.mxu1  ;;  %v4566_v3 = vpop.permute.xlu0 %4565 }
 0xe8a   : > { %v3881_v57 = vadd.f32 %v6735_v23, %v3880_v56  ;;  %4573 = vrot.lane.b32.xlu0 %v3886_v28, %s5830_s3  ;;  %v4612_v16 = vsel %vm3309_vm12, %v4610_v15, %v4566_v3 }
 0xe8b   : > { %v5637_v59 = vpop.f32.mrf.mxu1  ;;  %v4564_v7 = vpop.permute.xlu1 %4563 }
 0xe8c   : > { %4571 = vrot.lane.b32.xlu1 %v3881_v57, %s5830_s3  ;;  %v4135_v60 = vadd.f32 %v5637_v59, %v6670_v58  ;;  %v4611_v18 = vsel %vm3309_vm12, %v4609_v42, %v4564_v7 }
 0xe8d   : > { %v4129_v34 = vpop.f32.mrf.mxu1 }
 0xe8e   : > { %v4130_v61 = vadd.f32 %v6670_v58, %v4129_v34  ;;  %v4139_v52 = vmax.f32 %v4135_v60, 0.0 }
 0xe90   : > { %v4138_v62 = vmax.f32 %v4130_v61, 0.0 }
 0xe92   : > { %5646 = vmatprep.mubr.msk.f32.mxu1 %vm3309_vm12, %v4138_v62 }
 0xe93   : > { %5647 = vmatmul.mubr.msk.f32.vlgmr.msra.gmra.mxu1 %vm3309_vm12, %v4139_v52 }
 0xe94   : > { %5668 = vmatpush3.msra.mxu1 %v6594_v1  ;;  %5671 = vmatprep.mubr.msk.f32.mxu1 %vm2326_vm11, %v4388_v63 }
 0xe95   : > { %5669 = vmatprep.subr.mxu1 %v6598_v0 }
 0xe96   : > { %5670 = vmatpush3.msra.mxu1 %v6598_v0 }
 0xe97   : > { %5672 = vmatmul.mubr.msk.f32.vlgmr.msra.gmra.mxu1 %vm2326_vm11, %v4390_v35  ;;  %5674 = vmatprep.subr.mxu1 %v6634_v31 }
 0xe98   : > { %5675 = vmatpush3.msra.mxu1 %v6634_v31 }
 0xe99   : > { %5676 = vmatprep.subr.mxu1 %v6640_v32 }
 0xe9a   : > { %5677 = vmatpush3.msra.mxu1 %v6640_v32 }
 0xe9b   : > { %5678 = vmatprep.subr.mxu1 %v6645_v54 }
 0xe9c   : > { %5679 = vmatpush3.msra.mxu1 %v6645_v54 }
 0xe9d   : > { %5680 = vmatprep.subr.mxu1 %v6649_v55 }
 0xe9e   : > { %5681 = vmatpush3.msra.mxu1 %v6649_v55 }
 0xee0   : > { %v5630_v1 = vpop.f32.mrf.mxu0 }
 0xee1   : > { %v4052_v0 = vadd.f32 %v5630_v1, %v6735_v23 }
 0xee2   : > { %v4046_v36 = vpop.f32.mrf.mxu0 }
 0xee3   : > { %v4047_v33 = vadd.f32 %v6735_v23, %v4046_v36  ;;  %4581 = vrot.lane.b32.xlu0 %v4052_v0, %s5829_s7 }
 0xee4   : > { %v5655_v31 = vpop.f32.mrf.mxu0 }
 0xee5   : > { %4579 = vrot.lane.b32.xlu1 %v4047_v33, %s5829_s7  ;;  %v4301_v32 = vadd.f32 %v5655_v31, %v6670_v58 }
 0xee6   : > { %v4295_v37 = vpop.f32.mrf.mxu0 }
 0xee7   : > { %v4296_v54 = vadd.f32 %v6670_v58, %v4295_v37  ;;  %v4305_v39 = vmax.f32 %v4301_v32, 0.0 }
 0xee9   : > { %v4304_v38 = vmax.f32 %v4296_v54, 0.0 }
 0xeeb   : > { %5664 = vmatprep.mubr.msk.f32.mxu0 %vm3309_vm12, %v4304_v38 }
 0xeec   : > { %5665 = vmatmul.mubr.msk.f32.vlgmr.msra.gmra.mxu0 %vm3309_vm12, %v4305_v39 }
 0xefc   : > { %v4574_v8 = vpop.permute.xlu0 %4573 }
 0xefd   : > { %v4615_v29 = vsel %vm4613_vm13, %v4612_v16, %v4574_v8 }
 0xefe   : > { %v4572_v2 = vpop.permute.xlu1 %4571 }
 0xeff   : > { %v4614_v17 = vsel %vm4613_vm13, %v4611_v18, %v4572_v2 }
 0xf53   : > { %v5648_v55 = vpop.f32.mrf.mxu1 }
 0xf54   : > { %v4218_v40 = vadd.f32 %v5648_v55, %v6735_v23 }
 0xf55   : > { %v4212_v43 = vpop.f32.mrf.mxu1  ;;  %v4582_v9 = vpop.permute.xlu0 %4581 }
 0xf56   : > { %v4213_v44 = vadd.f32 %v6735_v23, %v4212_v43  ;;  %4589 = vrot.lane.b32.xlu0 %v4218_v40, %s5828_s9  ;;  %v4618_v27 = vsel %vm4616_vm14, %v4615_v29, %v4582_v9 }
 0xf57   : > { %v5673_v47 = vpop.f32.mrf.mxu1  ;;  %v4580_v10 = vpop.permute.xlu1 %4579 }
 0xf58   : > { %4587 = vrot.lane.b32.xlu1 %v4213_v44, %s5828_s9  ;;  %v4467_v48 = vadd.f32 %v5673_v47, %v6670_v58  ;;  %v4617_v56 = vsel %vm4616_vm14, %v4614_v17, %v4580_v10 }
 0xf59   : > { %v4461_v49 = vpop.f32.mrf.mxu1 }
 0xf5a   : > { %v4462_v50 = vadd.f32 %v6670_v58, %v4461_v49  ;;  %v4471_v53 = vmax.f32 %v4467_v48, 0.0 }
 0xf5c   : > { %v4470_v51 = vmax.f32 %v4462_v50, 0.0 }
 0xf5e   : > { %5682 = vmatprep.mubr.msk.f32.mxu1 %vm3309_vm12, %v4470_v51 }
 0xf5f   : > { %5683 = vmatmul.mubr.msk.f32.vlgmr.msra.gmra.mxu1 %vm3309_vm12, %v4471_v53 }
 0xfac   : > { %v5666_v22 = vpop.f32.mrf.mxu0 }
 0xfad   : > { %v4384_v21 = vadd.f32 %v5666_v22, %v6735_v23 }
 0xfae   : > { %v4378_v24 = vpop.f32.mrf.mxu0 }
 0xfaf   : > { %v4379_v20 = vadd.f32 %v6735_v23, %v4378_v24  ;;  %4597 = vrot.lane.b32.xlu0 %v4384_v21, %s5827_s27 }
 0xfb1   : > { %4595 = vrot.lane.b32.xlu1 %v4379_v20, %s5827_s27 }
 0xfc8   : > { %v4590_v11 = vpop.permute.xlu0 %4589 }
 0xfc9   : > { %v4621_v28 = vsel %vm4619_vm15, %v4618_v27, %v4590_v11 }
 0xfca   : > { %v4588_v13 = vpop.permute.xlu1 %4587 }
 0xfcb   : > { %v4620_v57 = vsel %vm4619_vm15, %v4617_v56, %v4588_v13 }
0x101f   : > { %v5684_v30 = vpop.f32.mrf.mxu1 }
0x1020   : > { %v4550_v26 = vadd.f32 %v5684_v30, %v6735_v23 }
0x1021   : > { %v4544_v58 = vpop.f32.mrf.mxu1  ;;  %v4598_v41 = vpop.permute.xlu0 %4597 }
0x1022   : > { %v4545_v5 = vadd.f32 %v6735_v23, %v4544_v58  ;;  %4605 = vrot.lane.b32.xlu0 %v4550_v26, %s5826_s23  ;;  %v4624_v46 = vsel %vm4622_vm0, %v4621_v28, %v4598_v41 }
0x1023   : > { %v4596_v45 = vpop.permute.xlu1 %4595 }
0x1024   : > { %4603 = vrot.lane.b32.xlu1 %v4545_v5, %s5826_s23  ;;  %v4623_v60 = vsel %vm4622_vm0, %v4620_v57, %v4596_v45 }
0x1094   : > { %v4606_v23 = vpop.permute.xlu0 %4605 }
0x1095   : > { %v4627_v59 = vsel %vm4625_vm1, %v4624_v46, %v4606_v23 }
0x1096   : > { %v4629_v34 = vadd.f32 %v4627_v59, %v6551_v25  ;;  %v4604_v61 = vpop.permute.xlu1 %4603  ;;  %4635 = sbr.rel (%p4983_p8) target bundleno = 4252 (0x109c), region = 120 }
0x1097   : > { %v4626_v62 = vsel %vm4625_vm1, %v4623_v60, %v4604_v61 }
0x1098   : > { %4631 = vst [vmem:[#allocation2 + $0x8] sm:$0xff] %v4629_v34  ;;  %v4628_v52 = vadd.f32 %v4626_v62, %v6548_v19 }
0x109a   : > { %4630 = vst [vmem:[#allocation2] sm:$0xff] %v4628_v52 }
0x109b   : > { %4636 = vst [vmem:[%s6254_s0] sm:$0xff] %v4628_v52  ;;  %4637 = vst [vmem:[%s6254_s0 + $0x8] sm:$0xff] %v4629_v34 }
0x109c PF: > { %s6943_s11 = sld [smem:[#allocation6_spill]] }
0x109d   : > { %s6944_s4 = sld [smem:[#allocation4_spill]] }
0x109e   : > { %s6945_s30 = sld [smem:[#allocation5_spill]] }
0x109f   : > { %s6946_s24 = sld [smem:[#allocation7_spill]] }
0x10a0   : > { %s6947_s25 = sld [smem:[#allocation8_spill]] }
0x10a2   : > { %s33_s5 = sadd.s32 1, %s6943_s11  }
0x10a3   : > { %p30_p9 = scmp.ge.s32.totalorder %s33_s5, 8  }
0x10a5   :  { %32 = sbr.rel (!%p30_p9) target bundleno = 20 (0x14), region = 198 }

</bundles_post_ra>
